<compile_context>
chip_gen: v6e
topology: v6e:2x2x1
jax: 0.10.0
libtpu: 0.0.40
codegen_flags: <defaults>
</compile_context>

<pallas_src>
import math

import jax
import jax.numpy as jnp
from jax.experimental import pallas as pl
from jax.experimental.pallas import tpu as pltpu

# ----------------------------- model config ---------------------------------
B = 2            # batch
S = 8            # sequence length
H = 32           # hidden size (768 in the real model)
NH = 4           # attention heads
HD = H // NH     # head dim
F = 64           # FFN intermediate size
L = 2            # encoder layers
O = 2            # output_dim (number of labels)
VOCAB = 50
TYPES = 2
LN_EPS = 1e-12
PACK = 128       # lane-dense packed output width (probs | weights | zero pad)


# ----------------------------- kernel helpers --------------------------------
def _layernorm(x, gamma, beta):
    mu = jnp.mean(x, axis=-1, keepdims=True)
    var = jnp.mean((x - mu) ** 2, axis=-1, keepdims=True)
    return (x - mu) * jax.lax.rsqrt(var + LN_EPS) * gamma + beta


def _gelu(x):
    # TODO(synk): HF BERT default uses the erf-based GELU; tanh approximation kept
    # for guaranteed Mosaic lowering (differs at ~1e-3 activation level).
    c = math.sqrt(2.0 / math.pi)
    return 0.5 * x * (1.0 + jnp.tanh(c * (x + 0.044715 * x * x * x)))


# --------------------------- fused Pallas kernel ------------------------------
def bert_fused_kernel(x_ref, bias_ref, emb_g_ref, emb_b_ref,
                      wqkv_ref, bqkv_ref, wo_ref, bo_ref,
                      g1_ref, be1_ref, w1_ref, b1_ref, w2_ref, b2_ref,
                      g2_ref, be2_ref,
                      pool_w_ref, pool_b_ref, cls_w_ref, cls_b_ref,
                      out_ref):
    # x_ref:    (1, S, H)  this batch element's embedding sum, pre-LayerNorm
    # bias_ref: (1, 1, S)  additive key bias (1 - mask) * -1e4 for this batch
    # stacked per-layer weights: leading axis L, indexed statically (loop unrolled).
    x = _layernorm(x_ref[0], emb_g_ref[...], emb_b_ref[...])      # (S, H) f32
    key_bias = bias_ref[0]                                        # (1, S)
    scale = 1.0 / math.sqrt(HD)

    weights_row = jnp.zeros((1, S), jnp.float32)   # last-layer head-mean CLS row

    for li in range(L):                            # static, fully unrolled layers
        # ---- fused Q|K|V projection: one MXU matmul (bf16 weights, f32 acc) ----
        qkv = jnp.dot(x.astype(jnp.bfloat16), wqkv_ref[li],
                      preferred_element_type=jnp.float32) + bqkv_ref[li]   # (S, 3H)

        # head batch: (NH, S, HD) — one-time lane slicing, no per-head matmuls
        def _heads(base):
            return jnp.stack(
                [qkv[:, base + h * HD: base + (h + 1) * HD] for h in range(NH)],
                axis=0)
        q = _heads(0)
        k = _heads(H)
        v = _heads(2 * H)

        # ---- one batched score matmul + ONE softmax over all heads ----
        scores = jnp.einsum('nqd,nkd->nqk', q, k,
                            preferred_element_type=jnp.float32) * scale + key_bias
        m = jnp.max(scores, axis=-1, keepdims=True)
        e = jnp.exp(scores - m)
        denom = jnp.sum(e, axis=-1, keepdims=True)
        if li == L - 1:
            probs = e / denom                       # exact: these become `weights`
            # CLS row (query 0) averaged over heads, extracted once
            weights_row = jnp.sum(probs[:, 0:1, :], axis=0) * (1.0 / NH)   # (1, S)
        else:
            probs = e * pl.reciprocal(denom, approx=True)                  # EUP

        # ---- one batched context matmul, then a single output projection ----
        ctx = jnp.einsum('nqk,nkd->nqd', probs, v,
                         preferred_element_type=jnp.float32)               # (NH, S, HD)
        ctx_flat = jnp.concatenate([ctx[h] for h in range(NH)], axis=-1)   # (S, H)
        attn_out = jnp.dot(ctx_flat.astype(jnp.bfloat16), wo_ref[li],
                           preferred_element_type=jnp.float32) + bo_ref[li]

        # ---- add&norm + FFN + add&norm ----
        x1 = _layernorm(x + attn_out, g1_ref[li], be1_ref[li])
        h1 = _gelu(jnp.dot(x1.astype(jnp.bfloat16), w1_ref[li],
                           preferred_element_type=jnp.float32) + b1_ref[li])
        h2 = jnp.dot(h1.astype(jnp.bfloat16), w2_ref[li],
                     preferred_element_type=jnp.float32) + b2_ref[li]
        x = _layernorm(x1 + h2, g2_ref[li], be2_ref[li])

    # -------- pooler + classification head --------
    cls_tok = x[0:1, :]                                                    # (1, H)
    pooled = jnp.tanh(jnp.dot(cls_tok.astype(jnp.bfloat16), pool_w_ref[...],
                              preferred_element_type=jnp.float32) + pool_b_ref[...])
    # TODO(synk): nn.Dropout(p=0.1) is identity at inference; train-mode dropout omitted.
    logits = jnp.dot(pooled.astype(jnp.bfloat16), cls_w_ref[...],
                     preferred_element_type=jnp.float32) + cls_b_ref[...]  # (1, O)
    lm = jnp.max(logits, axis=-1, keepdims=True)
    le = jnp.exp(logits - lm)
    probs_out = le / jnp.sum(le, axis=-1, keepdims=True)                   # (1, O)

    # lane-dense packed store: [ probs | weights | zero pad ] -> (1, 128)
    pad = jnp.zeros((1, PACK - O - S), jnp.float32)
    out_ref[0] = jnp.concatenate([probs_out, weights_row, pad], axis=-1)


# ------------------------------ wrappers --------------------------------------
def _const_spec(shape):
    n = len(shape)
    return pl.BlockSpec(shape, lambda b, _n=n: (0,) * _n)


def bert_fused_call(x_emb, key_bias, params):
    lp = params["layers"]
    weight_args = (params["emb_ln_g"], params["emb_ln_b"],
                   lp["wqkv"], lp["bqkv"], lp["wo"], lp["bo"],
                   lp["g1"], lp["be1"], lp["w1"], lp["b1"], lp["w2"], lp["b2"],
                   lp["g2"], lp["be2"],
                   params["pooler_w"], params["pooler_b"],
                   params["cls_w"], params["cls_b"])
    in_specs = ([pl.BlockSpec((1, S, H), lambda b: (b, 0, 0)),     # per-batch acts
                 pl.BlockSpec((1, 1, S), lambda b: (b, 0, 0))]     # per-batch bias
                + [_const_spec(a.shape) for a in weight_args])     # resident weights
    packed = pl.pallas_call(
        bert_fused_kernel,
        out_shape=jax.ShapeDtypeStruct((B, 1, PACK), jnp.float32),
        grid=(B,),
        in_specs=in_specs,
        out_specs=pl.BlockSpec((1, 1, PACK), lambda b: (b, 0, 0)),
        compiler_params=pltpu.CompilerParams(dimension_semantics=("parallel",)),
    )(x_emb, key_bias, *weight_args)
    probs = packed[:, 0, :O]
    weights = packed[:, 0, O:O + S]
    return probs, weights


def bert_forward(params, sentences, attention_mask, token_type_ids, ig=1.0):
    # ---- embeddings (gather/add is glue; everything else is one fused Pallas call) ----
    pos_ids = jnp.arange(S, dtype=jnp.int32)
    word = jnp.take(params["word_emb"], sentences, axis=0) * ig    # ig-scaled word emb
    pos = jnp.take(params["pos_emb"], pos_ids, axis=0)[None, :, :]
    typ = jnp.take(params["type_emb"], token_type_ids, axis=0)
    x_emb = (word + pos + typ).astype(jnp.float32)                 # (B, S, H)

    # per-batch additive key bias: valid key -> 0 ; padded key -> -1e4
    am = attention_mask.astype(jnp.float32)                        # (B, S)
    key_bias = ((1.0 - am) * -10000.0)[:, None, :]                 # (B, 1, S)

    return bert_fused_call(x_emb, key_bias, params)


# ------------------------- deterministic parameters ---------------------------
def init_params(key):
    def nrm(k, shape, scale=0.02):
        return (scale * jax.random.normal(k, shape)).astype(jnp.float32)

    keys = jax.random.split(key, 6 + L)
    params = {
        "word_emb": nrm(keys[0], (VOCAB, H)),
        "pos_emb": nrm(keys[1], (S, H)),
        "type_emb": nrm(keys[2], (TYPES, H)),
        "emb_ln_g": jnp.ones((1, H), jnp.float32),
        "emb_ln_b": jnp.zeros((1, H), jnp.float32),
        # bf16 matmul weights, f32 everything elementwise
        "pooler_w": nrm(keys[3], (H, H)).astype(jnp.bfloat16),
        "pooler_b": jnp.zeros((1, H), jnp.float32),
        # xavier-uniform classification head (matches torch init intent)
        "cls_w": (jax.random.uniform(keys[4], (H, O), minval=-1.0, maxval=1.0)
                  * math.sqrt(6.0 / (H + O))).astype(jnp.bfloat16),
        "cls_b": jnp.zeros((1, O), jnp.float32),
    }
    wqkv, bqkv, wo, bo = [], [], [], []
    g1, be1, w1, b1, w2, b2, g2, be2 = [], [], [], [], [], [], [], []
    for li in range(L):
        lk = jax.random.split(keys[5 + li], 8)
        wq_, wk_, wv_ = nrm(lk[0], (H, H)), nrm(lk[1], (H, H)), nrm(lk[2], (H, H))
        wqkv.append(jnp.concatenate([wq_, wk_, wv_], axis=-1).astype(jnp.bfloat16))
        bqkv.append(jnp.zeros((1, 3 * H), jnp.float32))
        wo.append(nrm(lk[3], (H, H)).astype(jnp.bfloat16))
        bo.append(jnp.zeros((1, H), jnp.float32))
        g1.append(jnp.ones((1, H), jnp.float32)); be1.append(jnp.zeros((1, H), jnp.float32))
        w1.append(nrm(lk[4], (H, F)).astype(jnp.bfloat16))
        b1.append(jnp.zeros((1, F), jnp.float32))
        w2.append(nrm(lk[5], (F, H)).astype(jnp.bfloat16))
        b2.append(jnp.zeros((1, H), jnp.float32))
        g2.append(jnp.ones((1, H), jnp.float32)); be2.append(jnp.zeros((1, H), jnp.float32))

    stk = lambda xs: jnp.stack(xs, axis=0)
    params["layers"] = {
        "wqkv": stk(wqkv), "bqkv": stk(bqkv), "wo": stk(wo), "bo": stk(bo),
        "g1": stk(g1), "be1": stk(be1), "w1": stk(w1), "b1": stk(b1),
        "w2": stk(w2), "b2": stk(b2), "g2": stk(g2), "be2": stk(be2),
    }
    return params


# ---------------------------------- main ---------------------------------------
if __name__ == "__main__":
    key = jax.random.PRNGKey(0)
    pkey, skey, tkey = jax.random.split(key, 3)

    params = init_params(pkey)

    # synthetic encode_plus-style inputs
    sentences = jax.random.randint(skey, (B, S), minval=0, maxval=VOCAB, dtype=jnp.int32)
    sentences = sentences.at[:, 0].set(2)                       # CLS-like token
    attention_mask = jnp.ones((B, S), dtype=jnp.float32)
    attention_mask = attention_mask.at[1, S - 2:].set(0.0)      # some padding
    token_type_ids = jnp.zeros((B, S), dtype=jnp.int32)

    forward = jax.jit(bert_forward)
    probs, weights = forward(params, sentences, attention_mask, token_type_ids)
    jax.block_until_ready((probs, weights))

    assert probs.shape == (B, O) and weights.shape == (B, S)
    assert bool(jnp.all(jnp.isfinite(probs))) and bool(jnp.all(jnp.isfinite(weights)))
    assert bool(jnp.allclose(jnp.sum(probs, axis=-1), 1.0, atol=1e-5))
    print("KERNEL_OK")
</pallas_src>

<mosaic_0001>
module attributes {stable_mosaic.version = 11 : i64} {
  func.func @bert_fused_kernel(%arg0: i32, %arg1: memref<1x8x32xf32, #tpu.memory_space<vmem>>, %arg2: memref<1x1x8xf32, #tpu.memory_space<vmem>>, %arg3: memref<1x32xf32, #tpu.memory_space<vmem>>, %arg4: memref<1x32xf32, #tpu.memory_space<vmem>>, %arg5: memref<2x32x96xbf16, #tpu.memory_space<vmem>>, %arg6: memref<2x1x96xf32, #tpu.memory_space<vmem>>, %arg7: memref<2x32x32xbf16, #tpu.memory_space<vmem>>, %arg8: memref<2x1x32xf32, #tpu.memory_space<vmem>>, %arg9: memref<2x1x32xf32, #tpu.memory_space<vmem>>, %arg10: memref<2x1x32xf32, #tpu.memory_space<vmem>>, %arg11: memref<2x32x64xbf16, #tpu.memory_space<vmem>>, %arg12: memref<2x1x64xf32, #tpu.memory_space<vmem>>, %arg13: memref<2x64x32xbf16, #tpu.memory_space<vmem>>, %arg14: memref<2x1x32xf32, #tpu.memory_space<vmem>>, %arg15: memref<2x1x32xf32, #tpu.memory_space<vmem>>, %arg16: memref<2x1x32xf32, #tpu.memory_space<vmem>>, %arg17: memref<32x32xbf16, #tpu.memory_space<vmem>>, %arg18: memref<1x32xf32, #tpu.memory_space<vmem>>, %arg19: memref<32x2xbf16, #tpu.memory_space<vmem>>, %arg20: memref<1x2xf32, #tpu.memory_space<vmem>>, %arg21: memref<1x1x128xf32, #tpu.memory_space<vmem>>) attributes {dimension_semantics = [#tpu.dimension_semantics<parallel>], iteration_bounds = array<i64: 2>, scalar_prefetch = 0 : i64, scratch_operands = 0 : i64, tpu.core_type = #tpu.core_type<tc>, window_params = [{transform_indices = @transform_0, window_bounds = array<i64: 1, 8, 32>}, {transform_indices = @transform_1, window_bounds = array<i64: 1, 1, 8>}, {pipeline_mode = #tpu.pipeline_mode<synchronous>, transform_indices = @transform_2, window_bounds = array<i64: 1, 32>}, {pipeline_mode = #tpu.pipeline_mode<synchronous>, transform_indices = @transform_3, window_bounds = array<i64: 1, 32>}, {pipeline_mode = #tpu.pipeline_mode<synchronous>, transform_indices = @transform_4, window_bounds = array<i64: 2, 32, 96>}, {pipeline_mode = #tpu.pipeline_mode<synchronous>, transform_indices = @transform_5, window_bounds = array<i64: 2, 1, 96>}, {pipeline_mode = #tpu.pipeline_mode<synchronous>, transform_indices = @transform_6, window_bounds = array<i64: 2, 32, 32>}, {pipeline_mode = #tpu.pipeline_mode<synchronous>, transform_indices = @transform_7, window_bounds = array<i64: 2, 1, 32>}, {pipeline_mode = #tpu.pipeline_mode<synchronous>, transform_indices = @transform_8, window_bounds = array<i64: 2, 1, 32>}, {pipeline_mode = #tpu.pipeline_mode<synchronous>, transform_indices = @transform_9, window_bounds = array<i64: 2, 1, 32>}, {pipeline_mode = #tpu.pipeline_mode<synchronous>, transform_indices = @transform_10, window_bounds = array<i64: 2, 32, 64>}, {pipeline_mode = #tpu.pipeline_mode<synchronous>, transform_indices = @transform_11, window_bounds = array<i64: 2, 1, 64>}, {pipeline_mode = #tpu.pipeline_mode<synchronous>, transform_indices = @transform_12, window_bounds = array<i64: 2, 64, 32>}, {pipeline_mode = #tpu.pipeline_mode<synchronous>, transform_indices = @transform_13, window_bounds = array<i64: 2, 1, 32>}, {pipeline_mode = #tpu.pipeline_mode<synchronous>, transform_indices = @transform_14, window_bounds = array<i64: 2, 1, 32>}, {pipeline_mode = #tpu.pipeline_mode<synchronous>, transform_indices = @transform_15, window_bounds = array<i64: 2, 1, 32>}, {pipeline_mode = #tpu.pipeline_mode<synchronous>, transform_indices = @transform_16, window_bounds = array<i64: 32, 32>}, {pipeline_mode = #tpu.pipeline_mode<synchronous>, transform_indices = @transform_17, window_bounds = array<i64: 1, 32>}, {pipeline_mode = #tpu.pipeline_mode<synchronous>, transform_indices = @transform_18, window_bounds = array<i64: 32, 2>}, {pipeline_mode = #tpu.pipeline_mode<synchronous>, transform_indices = @transform_19, window_bounds = array<i64: 1, 2>}, {transform_indices = @transform_20, window_bounds = array<i64: 1, 1, 128>}]} {
    %c0 = arith.constant 0 : index
    %c0_0 = arith.constant 0 : index
    %c0_1 = arith.constant 0 : index
    %0 = vector.load %arg1[%c0, %c0_0, %c0_1] : memref<1x8x32xf32, #tpu.memory_space<vmem>>, vector<1x8x32xf32>
    %1 = vector.shape_cast %0 : vector<1x8x32xf32> to vector<8x32xf32>
    %c0_2 = arith.constant 0 : index
    %c0_3 = arith.constant 0 : index
    %2 = vector.load %arg3[%c0_2, %c0_3] : memref<1x32xf32, #tpu.memory_space<vmem>>, vector<1x32xf32>
    %c0_4 = arith.constant 0 : index
    %c0_5 = arith.constant 0 : index
    %3 = vector.load %arg4[%c0_4, %c0_5] : memref<1x32xf32, #tpu.memory_space<vmem>>, vector<1x32xf32>
    %cst = arith.constant dense<0.000000e+00> : vector<8xf32>
    %4 = vector.multi_reduction <add>, %1, %cst [1] : vector<8x32xf32> to vector<8xf32>
    %5 = vector.shape_cast %4 : vector<8xf32> to vector<8x1xf32>
    %cst_6 = arith.constant 3.200000e+01 : f32
    %6 = vector.broadcast %cst_6 : f32 to vector<8x1xf32>
    %7 = arith.divf %5, %6 : vector<8x1xf32>
    %8 = vector.broadcast %7 : vector<8x1xf32> to vector<8x32xf32>
    %9 = arith.subf %1, %8 : vector<8x32xf32>
    %10 = arith.mulf %9, %9 : vector<8x32xf32>
    %cst_7 = arith.constant dense<0.000000e+00> : vector<8xf32>
    %11 = vector.multi_reduction <add>, %10, %cst_7 [1] : vector<8x32xf32> to vector<8xf32>
    %12 = vector.shape_cast %11 : vector<8xf32> to vector<8x1xf32>
    %cst_8 = arith.constant 3.200000e+01 : f32
    %13 = vector.broadcast %cst_8 : f32 to vector<8x1xf32>
    %14 = arith.divf %12, %13 : vector<8x1xf32>
    %15 = vector.broadcast %7 : vector<8x1xf32> to vector<8x32xf32>
    %16 = arith.subf %1, %15 : vector<8x32xf32>
    %cst_9 = arith.constant 9.99999996E-13 : f32
    %17 = vector.broadcast %cst_9 : f32 to vector<8x1xf32>
    %18 = arith.addf %14, %17 : vector<8x1xf32>
    %19 = math.rsqrt %18 : vector<8x1xf32>
    %20 = vector.broadcast %19 : vector<8x1xf32> to vector<8x32xf32>
    %21 = arith.mulf %16, %20 : vector<8x32xf32>
    %22 = vector.broadcast %2 : vector<1x32xf32> to vector<8x32xf32>
    %23 = arith.mulf %21, %22 : vector<8x32xf32>
    %24 = vector.broadcast %3 : vector<1x32xf32> to vector<8x32xf32>
    %25 = arith.addf %23, %24 : vector<8x32xf32>
    %c0_10 = arith.constant 0 : index
    %c0_11 = arith.constant 0 : index
    %c0_12 = arith.constant 0 : index
    %26 = vector.load %arg2[%c0_10, %c0_11, %c0_12] : memref<1x1x8xf32, #tpu.memory_space<vmem>>, vector<1x1x8xf32>
    %27 = vector.shape_cast %26 : vector<1x1x8xf32> to vector<1x8xf32>
    %28 = arith.truncf %25 : vector<8x32xf32> to vector<8x32xbf16>
    %c0_13 = arith.constant 0 : index
    %c0_14 = arith.constant 0 : index
    %c0_15 = arith.constant 0 : index
    %29 = vector.load %arg5[%c0_13, %c0_14, %c0_15] : memref<2x32x96xbf16, #tpu.memory_space<vmem>>, vector<1x32x96xbf16>
    %30 = vector.shape_cast %29 : vector<1x32x96xbf16> to vector<32x96xbf16>
    %cst_16 = arith.constant dense<0.000000e+00> : vector<8x96xf32>
    %31 = tpu.matmul %28, %30, %cst_16 {dimension_numbers = #tpu.dot_dimension_numbers<[1], [0], [0], [1], [0, 0, 1, 1], [], []>} : vector<8x32xbf16>, vector<32x96xbf16>, vector<8x96xf32> -> vector<8x96xf32>
    %c0_17 = arith.constant 0 : index
    %c0_18 = arith.constant 0 : index
    %c0_19 = arith.constant 0 : index
    %32 = vector.load %arg6[%c0_17, %c0_18, %c0_19] : memref<2x1x96xf32, #tpu.memory_space<vmem>>, vector<1x1x96xf32>
    %33 = vector.shape_cast %32 : vector<1x1x96xf32> to vector<1x96xf32>
    %34 = vector.broadcast %33 : vector<1x96xf32> to vector<8x96xf32>
    %35 = arith.addf %31, %34 : vector<8x96xf32>
    %36 = vector.extract_strided_slice %35 {offsets = [0, 0], sizes = [8, 8], strides = [1, 1]} : vector<8x96xf32> to vector<8x8xf32>
    %37 = vector.extract_strided_slice %35 {offsets = [0, 8], sizes = [8, 8], strides = [1, 1]} : vector<8x96xf32> to vector<8x8xf32>
    %38 = vector.extract_strided_slice %35 {offsets = [0, 16], sizes = [8, 8], strides = [1, 1]} : vector<8x96xf32> to vector<8x8xf32>
    %39 = vector.extract_strided_slice %35 {offsets = [0, 24], sizes = [8, 8], strides = [1, 1]} : vector<8x96xf32> to vector<8x8xf32>
    %40 = vector.shape_cast %36 : vector<8x8xf32> to vector<1x8x8xf32>
    %41 = vector.shape_cast %37 : vector<8x8xf32> to vector<1x8x8xf32>
    %42 = vector.shape_cast %38 : vector<8x8xf32> to vector<1x8x8xf32>
    %43 = vector.shape_cast %39 : vector<8x8xf32> to vector<1x8x8xf32>
    %44 = tpu.concatenate %40, %41, %42, %43 in 0 : vector<1x8x8xf32>, vector<1x8x8xf32>, vector<1x8x8xf32>, vector<1x8x8xf32> -> vector<4x8x8xf32>
    %45 = vector.extract_strided_slice %35 {offsets = [0, 32], sizes = [8, 8], strides = [1, 1]} : vector<8x96xf32> to vector<8x8xf32>
    %46 = vector.extract_strided_slice %35 {offsets = [0, 40], sizes = [8, 8], strides = [1, 1]} : vector<8x96xf32> to vector<8x8xf32>
    %47 = vector.extract_strided_slice %35 {offsets = [0, 48], sizes = [8, 8], strides = [1, 1]} : vector<8x96xf32> to vector<8x8xf32>
    %48 = vector.extract_strided_slice %35 {offsets = [0, 56], sizes = [8, 8], strides = [1, 1]} : vector<8x96xf32> to vector<8x8xf32>
    %49 = vector.shape_cast %45 : vector<8x8xf32> to vector<1x8x8xf32>
    %50 = vector.shape_cast %46 : vector<8x8xf32> to vector<1x8x8xf32>
    %51 = vector.shape_cast %47 : vector<8x8xf32> to vector<1x8x8xf32>
    %52 = vector.shape_cast %48 : vector<8x8xf32> to vector<1x8x8xf32>
    %53 = tpu.concatenate %49, %50, %51, %52 in 0 : vector<1x8x8xf32>, vector<1x8x8xf32>, vector<1x8x8xf32>, vector<1x8x8xf32> -> vector<4x8x8xf32>
    %54 = vector.extract_strided_slice %35 {offsets = [0, 64], sizes = [8, 8], strides = [1, 1]} : vector<8x96xf32> to vector<8x8xf32>
    %55 = vector.extract_strided_slice %35 {offsets = [0, 72], sizes = [8, 8], strides = [1, 1]} : vector<8x96xf32> to vector<8x8xf32>
    %56 = vector.extract_strided_slice %35 {offsets = [0, 80], sizes = [8, 8], strides = [1, 1]} : vector<8x96xf32> to vector<8x8xf32>
    %57 = vector.extract_strided_slice %35 {offsets = [0, 88], sizes = [8, 8], strides = [1, 1]} : vector<8x96xf32> to vector<8x8xf32>
    %58 = vector.shape_cast %54 : vector<8x8xf32> to vector<1x8x8xf32>
    %59 = vector.shape_cast %55 : vector<8x8xf32> to vector<1x8x8xf32>
    %60 = vector.shape_cast %56 : vector<8x8xf32> to vector<1x8x8xf32>
    %61 = vector.shape_cast %57 : vector<8x8xf32> to vector<1x8x8xf32>
    %62 = tpu.concatenate %58, %59, %60, %61 in 0 : vector<1x8x8xf32>, vector<1x8x8xf32>, vector<1x8x8xf32>, vector<1x8x8xf32> -> vector<4x8x8xf32>
    "tpu.trace_start"() <{level = 10 : i32, message = "nqd,nkd->nqk"}> : () -> ()
    %cst_20 = arith.constant dense<0.000000e+00> : vector<4x8x8xf32>
    %63 = tpu.matmul %44, %53, %cst_20 {dimension_numbers = #tpu.dot_dimension_numbers<[2], [2], [1], [1], [0, 0, 0, 1, 1, 1], [0], [0]>} : vector<4x8x8xf32>, vector<4x8x8xf32>, vector<4x8x8xf32> -> vector<4x8x8xf32>
    "tpu.trace_stop"() : () -> ()
    %cst_21 = arith.constant 0.353553385 : f32
    %64 = vector.broadcast %cst_21 : f32 to vector<4x8x8xf32>
    %65 = arith.mulf %63, %64 : vector<4x8x8xf32>
    %66 = vector.shape_cast %27 : vector<1x8xf32> to vector<1x1x8xf32>
    %67 = vector.broadcast %66 : vector<1x1x8xf32> to vector<4x8x8xf32>
    %68 = arith.addf %65, %67 : vector<4x8x8xf32>
    %cst_22 = arith.constant dense<0xFF800000> : vector<4x8xf32>
    %69 = vector.multi_reduction <maximumf>, %68, %cst_22 [2] : vector<4x8x8xf32> to vector<4x8xf32>
    %70 = vector.shape_cast %69 : vector<4x8xf32> to vector<4x8x1xf32>
    %71 = vector.broadcast %70 : vector<4x8x1xf32> to vector<4x8x8xf32>
    %72 = arith.subf %68, %71 : vector<4x8x8xf32>
    %73 = math.exp %72 : vector<4x8x8xf32>
    %cst_23 = arith.constant dense<0.000000e+00> : vector<4x8xf32>
    %74 = vector.multi_reduction <add>, %73, %cst_23 [2] : vector<4x8x8xf32> to vector<4x8xf32>
    %75 = vector.shape_cast %74 : vector<4x8xf32> to vector<4x8x1xf32>
    %76 = tpu.reciprocal %75 {approx = true} : vector<4x8x1xf32> -> vector<4x8x1xf32>
    %77 = vector.broadcast %76 : vector<4x8x1xf32> to vector<4x8x8xf32>
    %78 = arith.mulf %73, %77 : vector<4x8x8xf32>
    "tpu.trace_start"() <{level = 10 : i32, message = "nqk,nkd->nqd"}> : () -> ()
    %cst_24 = arith.constant dense<0.000000e+00> : vector<4x8x8xf32>
    %79 = tpu.matmul %78, %62, %cst_24 {dimension_numbers = #tpu.dot_dimension_numbers<[2], [1], [1], [2], [0, 0, 0, 1, 1, 2], [0], [0]>} : vector<4x8x8xf32>, vector<4x8x8xf32>, vector<4x8x8xf32> -> vector<4x8x8xf32>
    "tpu.trace_stop"() : () -> ()
    %80 = vector.extract_strided_slice %79 {offsets = [0, 0, 0], sizes = [1, 8, 8], strides = [1, 1, 1]} : vector<4x8x8xf32> to vector<1x8x8xf32>
    %81 = vector.shape_cast %80 : vector<1x8x8xf32> to vector<8x8xf32>
    %82 = vector.extract_strided_slice %79 {offsets = [1, 0, 0], sizes = [1, 8, 8], strides = [1, 1, 1]} : vector<4x8x8xf32> to vector<1x8x8xf32>
    %83 = vector.shape_cast %82 : vector<1x8x8xf32> to vector<8x8xf32>
    %84 = vector.extract_strided_slice %79 {offsets = [2, 0, 0], sizes = [1, 8, 8], strides = [1, 1, 1]} : vector<4x8x8xf32> to vector<1x8x8xf32>
    %85 = vector.shape_cast %84 : vector<1x8x8xf32> to vector<8x8xf32>
    %86 = vector.extract_strided_slice %79 {offsets = [3, 0, 0], sizes = [1, 8, 8], strides = [1, 1, 1]} : vector<4x8x8xf32> to vector<1x8x8xf32>
    %87 = vector.shape_cast %86 : vector<1x8x8xf32> to vector<8x8xf32>
    %88 = tpu.concatenate %81, %83, %85, %87 in 1 : vector<8x8xf32>, vector<8x8xf32>, vector<8x8xf32>, vector<8x8xf32> -> vector<8x32xf32>
    %89 = arith.truncf %88 : vector<8x32xf32> to vector<8x32xbf16>
    %c0_25 = arith.constant 0 : index
    %c0_26 = arith.constant 0 : index
    %c0_27 = arith.constant 0 : index
    %90 = vector.load %arg7[%c0_25, %c0_26, %c0_27] : memref<2x32x32xbf16, #tpu.memory_space<vmem>>, vector<1x32x32xbf16>
    %91 = vector.shape_cast %90 : vector<1x32x32xbf16> to vector<32x32xbf16>
    %cst_28 = arith.constant dense<0.000000e+00> : vector<8x32xf32>
    %92 = tpu.matmul %89, %91, %cst_28 {dimension_numbers = #tpu.dot_dimension_numbers<[1], [0], [0], [1], [0, 0, 1, 1], [], []>} : vector<8x32xbf16>, vector<32x32xbf16>, vector<8x32xf32> -> vector<8x32xf32>
    %c0_29 = arith.constant 0 : index
    %c0_30 = arith.constant 0 : index
    %c0_31 = arith.constant 0 : index
    %93 = vector.load %arg8[%c0_29, %c0_30, %c0_31] : memref<2x1x32xf32, #tpu.memory_space<vmem>>, vector<1x1x32xf32>
    %94 = vector.shape_cast %93 : vector<1x1x32xf32> to vector<1x32xf32>
    %95 = vector.broadcast %94 : vector<1x32xf32> to vector<8x32xf32>
    %96 = arith.addf %92, %95 : vector<8x32xf32>
    %97 = arith.addf %25, %96 : vector<8x32xf32>
    %c0_32 = arith.constant 0 : index
    %c0_33 = arith.constant 0 : index
    %c0_34 = arith.constant 0 : index
    %98 = vector.load %arg9[%c0_32, %c0_33, %c0_34] : memref<2x1x32xf32, #tpu.memory_space<vmem>>, vector<1x1x32xf32>
    %99 = vector.shape_cast %98 : vector<1x1x32xf32> to vector<1x32xf32>
    %c0_35 = arith.constant 0 : index
    %c0_36 = arith.constant 0 : index
    %c0_37 = arith.constant 0 : index
    %100 = vector.load %arg10[%c0_35, %c0_36, %c0_37] : memref<2x1x32xf32, #tpu.memory_space<vmem>>, vector<1x1x32xf32>
    %101 = vector.shape_cast %100 : vector<1x1x32xf32> to vector<1x32xf32>
    %cst_38 = arith.constant dense<0.000000e+00> : vector<8xf32>
    %102 = vector.multi_reduction <add>, %97, %cst_38 [1] : vector<8x32xf32> to vector<8xf32>
    %103 = vector.shape_cast %102 : vector<8xf32> to vector<8x1xf32>
    %cst_39 = arith.constant 3.200000e+01 : f32
    %104 = vector.broadcast %cst_39 : f32 to vector<8x1xf32>
    %105 = arith.divf %103, %104 : vector<8x1xf32>
    %106 = vector.broadcast %105 : vector<8x1xf32> to vector<8x32xf32>
    %107 = arith.subf %97, %106 : vector<8x32xf32>
    %108 = arith.mulf %107, %107 : vector<8x32xf32>
    %cst_40 = arith.constant dense<0.000000e+00> : vector<8xf32>
    %109 = vector.multi_reduction <add>, %108, %cst_40 [1] : vector<8x32xf32> to vector<8xf32>
    %110 = vector.shape_cast %109 : vector<8xf32> to vector<8x1xf32>
    %cst_41 = arith.constant 3.200000e+01 : f32
    %111 = vector.broadcast %cst_41 : f32 to vector<8x1xf32>
    %112 = arith.divf %110, %111 : vector<8x1xf32>
    %113 = vector.broadcast %105 : vector<8x1xf32> to vector<8x32xf32>
    %114 = arith.subf %97, %113 : vector<8x32xf32>
    %cst_42 = arith.constant 9.99999996E-13 : f32
    %115 = vector.broadcast %cst_42 : f32 to vector<8x1xf32>
    %116 = arith.addf %112, %115 : vector<8x1xf32>
    %117 = math.rsqrt %116 : vector<8x1xf32>
    %118 = vector.broadcast %117 : vector<8x1xf32> to vector<8x32xf32>
    %119 = arith.mulf %114, %118 : vector<8x32xf32>
    %120 = vector.broadcast %99 : vector<1x32xf32> to vector<8x32xf32>
    %121 = arith.mulf %119, %120 : vector<8x32xf32>
    %122 = vector.broadcast %101 : vector<1x32xf32> to vector<8x32xf32>
    %123 = arith.addf %121, %122 : vector<8x32xf32>
    %124 = arith.truncf %123 : vector<8x32xf32> to vector<8x32xbf16>
    %c0_43 = arith.constant 0 : index
    %c0_44 = arith.constant 0 : index
    %c0_45 = arith.constant 0 : index
    %125 = vector.load %arg11[%c0_43, %c0_44, %c0_45] : memref<2x32x64xbf16, #tpu.memory_space<vmem>>, vector<1x32x64xbf16>
    %126 = vector.shape_cast %125 : vector<1x32x64xbf16> to vector<32x64xbf16>
    %cst_46 = arith.constant dense<0.000000e+00> : vector<8x64xf32>
    %127 = tpu.matmul %124, %126, %cst_46 {dimension_numbers = #tpu.dot_dimension_numbers<[1], [0], [0], [1], [0, 0, 1, 1], [], []>} : vector<8x32xbf16>, vector<32x64xbf16>, vector<8x64xf32> -> vector<8x64xf32>
    %c0_47 = arith.constant 0 : index
    %c0_48 = arith.constant 0 : index
    %c0_49 = arith.constant 0 : index
    %128 = vector.load %arg12[%c0_47, %c0_48, %c0_49] : memref<2x1x64xf32, #tpu.memory_space<vmem>>, vector<1x1x64xf32>
    %129 = vector.shape_cast %128 : vector<1x1x64xf32> to vector<1x64xf32>
    %130 = vector.broadcast %129 : vector<1x64xf32> to vector<8x64xf32>
    %131 = arith.addf %127, %130 : vector<8x64xf32>
    %cst_50 = arith.constant 5.000000e-01 : f32
    %132 = vector.broadcast %cst_50 : f32 to vector<8x64xf32>
    %133 = arith.mulf %132, %131 : vector<8x64xf32>
    %cst_51 = arith.constant 4.471500e-02 : f32
    %134 = vector.broadcast %cst_51 : f32 to vector<8x64xf32>
    %135 = arith.mulf %134, %131 : vector<8x64xf32>
    %136 = arith.mulf %135, %131 : vector<8x64xf32>
    %137 = arith.mulf %136, %131 : vector<8x64xf32>
    %138 = arith.addf %131, %137 : vector<8x64xf32>
    %cst_52 = arith.constant 0.797884583 : f32
    %139 = vector.broadcast %cst_52 : f32 to vector<8x64xf32>
    %140 = arith.mulf %139, %138 : vector<8x64xf32>
    %141 = math.tanh %140 : vector<8x64xf32>
    %cst_53 = arith.constant 1.000000e+00 : f32
    %142 = vector.broadcast %cst_53 : f32 to vector<8x64xf32>
    %143 = arith.addf %142, %141 : vector<8x64xf32>
    %144 = arith.mulf %133, %143 : vector<8x64xf32>
    %145 = arith.truncf %144 : vector<8x64xf32> to vector<8x64xbf16>
    %c0_54 = arith.constant 0 : index
    %c0_55 = arith.constant 0 : index
    %c0_56 = arith.constant 0 : index
    %146 = vector.load %arg13[%c0_54, %c0_55, %c0_56] : memref<2x64x32xbf16, #tpu.memory_space<vmem>>, vector<1x64x32xbf16>
    %147 = vector.shape_cast %146 : vector<1x64x32xbf16> to vector<64x32xbf16>
    %cst_57 = arith.constant dense<0.000000e+00> : vector<8x32xf32>
    %148 = tpu.matmul %145, %147, %cst_57 {dimension_numbers = #tpu.dot_dimension_numbers<[1], [0], [0], [1], [0, 0, 1, 1], [], []>} : vector<8x64xbf16>, vector<64x32xbf16>, vector<8x32xf32> -> vector<8x32xf32>
    %c0_58 = arith.constant 0 : index
    %c0_59 = arith.constant 0 : index
    %c0_60 = arith.constant 0 : index
    %149 = vector.load %arg14[%c0_58, %c0_59, %c0_60] : memref<2x1x32xf32, #tpu.memory_space<vmem>>, vector<1x1x32xf32>
    %150 = vector.shape_cast %149 : vector<1x1x32xf32> to vector<1x32xf32>
    %151 = vector.broadcast %150 : vector<1x32xf32> to vector<8x32xf32>
    %152 = arith.addf %148, %151 : vector<8x32xf32>
    %153 = arith.addf %123, %152 : vector<8x32xf32>
    %c0_61 = arith.constant 0 : index
    %c0_62 = arith.constant 0 : index
    %c0_63 = arith.constant 0 : index
    %154 = vector.load %arg15[%c0_61, %c0_62, %c0_63] : memref<2x1x32xf32, #tpu.memory_space<vmem>>, vector<1x1x32xf32>
    %155 = vector.shape_cast %154 : vector<1x1x32xf32> to vector<1x32xf32>
    %c0_64 = arith.constant 0 : index
    %c0_65 = arith.constant 0 : index
    %c0_66 = arith.constant 0 : index
    %156 = vector.load %arg16[%c0_64, %c0_65, %c0_66] : memref<2x1x32xf32, #tpu.memory_space<vmem>>, vector<1x1x32xf32>
    %157 = vector.shape_cast %156 : vector<1x1x32xf32> to vector<1x32xf32>
    %cst_67 = arith.constant dense<0.000000e+00> : vector<8xf32>
    %158 = vector.multi_reduction <add>, %153, %cst_67 [1] : vector<8x32xf32> to vector<8xf32>
    %159 = vector.shape_cast %158 : vector<8xf32> to vector<8x1xf32>
    %cst_68 = arith.constant 3.200000e+01 : f32
    %160 = vector.broadcast %cst_68 : f32 to vector<8x1xf32>
    %161 = arith.divf %159, %160 : vector<8x1xf32>
    %162 = vector.broadcast %161 : vector<8x1xf32> to vector<8x32xf32>
    %163 = arith.subf %153, %162 : vector<8x32xf32>
    %164 = arith.mulf %163, %163 : vector<8x32xf32>
    %cst_69 = arith.constant dense<0.000000e+00> : vector<8xf32>
    %165 = vector.multi_reduction <add>, %164, %cst_69 [1] : vector<8x32xf32> to vector<8xf32>
    %166 = vector.shape_cast %165 : vector<8xf32> to vector<8x1xf32>
    %cst_70 = arith.constant 3.200000e+01 : f32
    %167 = vector.broadcast %cst_70 : f32 to vector<8x1xf32>
    %168 = arith.divf %166, %167 : vector<8x1xf32>
    %169 = vector.broadcast %161 : vector<8x1xf32> to vector<8x32xf32>
    %170 = arith.subf %153, %169 : vector<8x32xf32>
    %cst_71 = arith.constant 9.99999996E-13 : f32
    %171 = vector.broadcast %cst_71 : f32 to vector<8x1xf32>
    %172 = arith.addf %168, %171 : vector<8x1xf32>
    %173 = math.rsqrt %172 : vector<8x1xf32>
    %174 = vector.broadcast %173 : vector<8x1xf32> to vector<8x32xf32>
    %175 = arith.mulf %170, %174 : vector<8x32xf32>
    %176 = vector.broadcast %155 : vector<1x32xf32> to vector<8x32xf32>
    %177 = arith.mulf %175, %176 : vector<8x32xf32>
    %178 = vector.broadcast %157 : vector<1x32xf32> to vector<8x32xf32>
    %179 = arith.addf %177, %178 : vector<8x32xf32>
    %180 = arith.truncf %179 : vector<8x32xf32> to vector<8x32xbf16>
    %c1 = arith.constant 1 : index
    %c0_72 = arith.constant 0 : index
    %c0_73 = arith.constant 0 : index
    %181 = vector.load %arg5[%c1, %c0_72, %c0_73] : memref<2x32x96xbf16, #tpu.memory_space<vmem>>, vector<1x32x96xbf16>
    %182 = vector.shape_cast %181 : vector<1x32x96xbf16> to vector<32x96xbf16>
    %cst_74 = arith.constant dense<0.000000e+00> : vector<8x96xf32>
    %183 = tpu.matmul %180, %182, %cst_74 {dimension_numbers = #tpu.dot_dimension_numbers<[1], [0], [0], [1], [0, 0, 1, 1], [], []>} : vector<8x32xbf16>, vector<32x96xbf16>, vector<8x96xf32> -> vector<8x96xf32>
    %c1_75 = arith.constant 1 : index
    %c0_76 = arith.constant 0 : index
    %c0_77 = arith.constant 0 : index
    %184 = vector.load %arg6[%c1_75, %c0_76, %c0_77] : memref<2x1x96xf32, #tpu.memory_space<vmem>>, vector<1x1x96xf32>
    %185 = vector.shape_cast %184 : vector<1x1x96xf32> to vector<1x96xf32>
    %186 = vector.broadcast %185 : vector<1x96xf32> to vector<8x96xf32>
    %187 = arith.addf %183, %186 : vector<8x96xf32>
    %188 = vector.extract_strided_slice %187 {offsets = [0, 0], sizes = [8, 8], strides = [1, 1]} : vector<8x96xf32> to vector<8x8xf32>
    %189 = vector.extract_strided_slice %187 {offsets = [0, 8], sizes = [8, 8], strides = [1, 1]} : vector<8x96xf32> to vector<8x8xf32>
    %190 = vector.extract_strided_slice %187 {offsets = [0, 16], sizes = [8, 8], strides = [1, 1]} : vector<8x96xf32> to vector<8x8xf32>
    %191 = vector.extract_strided_slice %187 {offsets = [0, 24], sizes = [8, 8], strides = [1, 1]} : vector<8x96xf32> to vector<8x8xf32>
    %192 = vector.shape_cast %188 : vector<8x8xf32> to vector<1x8x8xf32>
    %193 = vector.shape_cast %189 : vector<8x8xf32> to vector<1x8x8xf32>
    %194 = vector.shape_cast %190 : vector<8x8xf32> to vector<1x8x8xf32>
    %195 = vector.shape_cast %191 : vector<8x8xf32> to vector<1x8x8xf32>
    %196 = tpu.concatenate %192, %193, %194, %195 in 0 : vector<1x8x8xf32>, vector<1x8x8xf32>, vector<1x8x8xf32>, vector<1x8x8xf32> -> vector<4x8x8xf32>
    %197 = vector.extract_strided_slice %187 {offsets = [0, 32], sizes = [8, 8], strides = [1, 1]} : vector<8x96xf32> to vector<8x8xf32>
    %198 = vector.extract_strided_slice %187 {offsets = [0, 40], sizes = [8, 8], strides = [1, 1]} : vector<8x96xf32> to vector<8x8xf32>
    %199 = vector.extract_strided_slice %187 {offsets = [0, 48], sizes = [8, 8], strides = [1, 1]} : vector<8x96xf32> to vector<8x8xf32>
    %200 = vector.extract_strided_slice %187 {offsets = [0, 56], sizes = [8, 8], strides = [1, 1]} : vector<8x96xf32> to vector<8x8xf32>
    %201 = vector.shape_cast %197 : vector<8x8xf32> to vector<1x8x8xf32>
    %202 = vector.shape_cast %198 : vector<8x8xf32> to vector<1x8x8xf32>
    %203 = vector.shape_cast %199 : vector<8x8xf32> to vector<1x8x8xf32>
    %204 = vector.shape_cast %200 : vector<8x8xf32> to vector<1x8x8xf32>
    %205 = tpu.concatenate %201, %202, %203, %204 in 0 : vector<1x8x8xf32>, vector<1x8x8xf32>, vector<1x8x8xf32>, vector<1x8x8xf32> -> vector<4x8x8xf32>
    %206 = vector.extract_strided_slice %187 {offsets = [0, 64], sizes = [8, 8], strides = [1, 1]} : vector<8x96xf32> to vector<8x8xf32>
    %207 = vector.extract_strided_slice %187 {offsets = [0, 72], sizes = [8, 8], strides = [1, 1]} : vector<8x96xf32> to vector<8x8xf32>
    %208 = vector.extract_strided_slice %187 {offsets = [0, 80], sizes = [8, 8], strides = [1, 1]} : vector<8x96xf32> to vector<8x8xf32>
    %209 = vector.extract_strided_slice %187 {offsets = [0, 88], sizes = [8, 8], strides = [1, 1]} : vector<8x96xf32> to vector<8x8xf32>
    %210 = vector.shape_cast %206 : vector<8x8xf32> to vector<1x8x8xf32>
    %211 = vector.shape_cast %207 : vector<8x8xf32> to vector<1x8x8xf32>
    %212 = vector.shape_cast %208 : vector<8x8xf32> to vector<1x8x8xf32>
    %213 = vector.shape_cast %209 : vector<8x8xf32> to vector<1x8x8xf32>
    %214 = tpu.concatenate %210, %211, %212, %213 in 0 : vector<1x8x8xf32>, vector<1x8x8xf32>, vector<1x8x8xf32>, vector<1x8x8xf32> -> vector<4x8x8xf32>
    "tpu.trace_start"() <{level = 10 : i32, message = "nqd,nkd->nqk"}> : () -> ()
    %cst_78 = arith.constant dense<0.000000e+00> : vector<4x8x8xf32>
    %215 = tpu.matmul %196, %205, %cst_78 {dimension_numbers = #tpu.dot_dimension_numbers<[2], [2], [1], [1], [0, 0, 0, 1, 1, 1], [0], [0]>} : vector<4x8x8xf32>, vector<4x8x8xf32>, vector<4x8x8xf32> -> vector<4x8x8xf32>
    "tpu.trace_stop"() : () -> ()
    %cst_79 = arith.constant 0.353553385 : f32
    %216 = vector.broadcast %cst_79 : f32 to vector<4x8x8xf32>
    %217 = arith.mulf %215, %216 : vector<4x8x8xf32>
    %218 = vector.shape_cast %27 : vector<1x8xf32> to vector<1x1x8xf32>
    %219 = vector.broadcast %218 : vector<1x1x8xf32> to vector<4x8x8xf32>
    %220 = arith.addf %217, %219 : vector<4x8x8xf32>
    %cst_80 = arith.constant dense<0xFF800000> : vector<4x8xf32>
    %221 = vector.multi_reduction <maximumf>, %220, %cst_80 [2] : vector<4x8x8xf32> to vector<4x8xf32>
    %222 = vector.shape_cast %221 : vector<4x8xf32> to vector<4x8x1xf32>
    %223 = vector.broadcast %222 : vector<4x8x1xf32> to vector<4x8x8xf32>
    %224 = arith.subf %220, %223 : vector<4x8x8xf32>
    %225 = math.exp %224 : vector<4x8x8xf32>
    %cst_81 = arith.constant dense<0.000000e+00> : vector<4x8xf32>
    %226 = vector.multi_reduction <add>, %225, %cst_81 [2] : vector<4x8x8xf32> to vector<4x8xf32>
    %227 = vector.shape_cast %226 : vector<4x8xf32> to vector<4x8x1xf32>
    %228 = vector.broadcast %227 : vector<4x8x1xf32> to vector<4x8x8xf32>
    %229 = arith.divf %225, %228 : vector<4x8x8xf32>
    %230 = vector.extract_strided_slice %229 {offsets = [0, 0, 0], sizes = [4, 1, 8], strides = [1, 1, 1]} : vector<4x8x8xf32> to vector<4x1x8xf32>
    %cst_82 = arith.constant dense<0.000000e+00> : vector<1x8xf32>
    %231 = vector.multi_reduction <add>, %230, %cst_82 [0] : vector<4x1x8xf32> to vector<1x8xf32>
    %cst_83 = arith.constant 2.500000e-01 : f32
    %232 = vector.broadcast %cst_83 : f32 to vector<1x8xf32>
    %233 = arith.mulf %231, %232 : vector<1x8xf32>
    "tpu.trace_start"() <{level = 10 : i32, message = "nqk,nkd->nqd"}> : () -> ()
    %cst_84 = arith.constant dense<0.000000e+00> : vector<4x8x8xf32>
    %234 = tpu.matmul %229, %214, %cst_84 {dimension_numbers = #tpu.dot_dimension_numbers<[2], [1], [1], [2], [0, 0, 0, 1, 1, 2], [0], [0]>} : vector<4x8x8xf32>, vector<4x8x8xf32>, vector<4x8x8xf32> -> vector<4x8x8xf32>
    "tpu.trace_stop"() : () -> ()
    %235 = vector.extract_strided_slice %234 {offsets = [0, 0, 0], sizes = [1, 8, 8], strides = [1, 1, 1]} : vector<4x8x8xf32> to vector<1x8x8xf32>
    %236 = vector.shape_cast %235 : vector<1x8x8xf32> to vector<8x8xf32>
    %237 = vector.extract_strided_slice %234 {offsets = [1, 0, 0], sizes = [1, 8, 8], strides = [1, 1, 1]} : vector<4x8x8xf32> to vector<1x8x8xf32>
    %238 = vector.shape_cast %237 : vector<1x8x8xf32> to vector<8x8xf32>
    %239 = vector.extract_strided_slice %234 {offsets = [2, 0, 0], sizes = [1, 8, 8], strides = [1, 1, 1]} : vector<4x8x8xf32> to vector<1x8x8xf32>
    %240 = vector.shape_cast %239 : vector<1x8x8xf32> to vector<8x8xf32>
    %241 = vector.extract_strided_slice %234 {offsets = [3, 0, 0], sizes = [1, 8, 8], strides = [1, 1, 1]} : vector<4x8x8xf32> to vector<1x8x8xf32>
    %242 = vector.shape_cast %241 : vector<1x8x8xf32> to vector<8x8xf32>
    %243 = tpu.concatenate %236, %238, %240, %242 in 1 : vector<8x8xf32>, vector<8x8xf32>, vector<8x8xf32>, vector<8x8xf32> -> vector<8x32xf32>
    %244 = arith.truncf %243 : vector<8x32xf32> to vector<8x32xbf16>
    %c1_85 = arith.constant 1 : index
    %c0_86 = arith.constant 0 : index
    %c0_87 = arith.constant 0 : index
    %245 = vector.load %arg7[%c1_85, %c0_86, %c0_87] : memref<2x32x32xbf16, #tpu.memory_space<vmem>>, vector<1x32x32xbf16>
    %246 = vector.shape_cast %245 : vector<1x32x32xbf16> to vector<32x32xbf16>
    %cst_88 = arith.constant dense<0.000000e+00> : vector<8x32xf32>
    %247 = tpu.matmul %244, %246, %cst_88 {dimension_numbers = #tpu.dot_dimension_numbers<[1], [0], [0], [1], [0, 0, 1, 1], [], []>} : vector<8x32xbf16>, vector<32x32xbf16>, vector<8x32xf32> -> vector<8x32xf32>
    %c1_89 = arith.constant 1 : index
    %c0_90 = arith.constant 0 : index
    %c0_91 = arith.constant 0 : index
    %248 = vector.load %arg8[%c1_89, %c0_90, %c0_91] : memref<2x1x32xf32, #tpu.memory_space<vmem>>, vector<1x1x32xf32>
    %249 = vector.shape_cast %248 : vector<1x1x32xf32> to vector<1x32xf32>
    %250 = vector.broadcast %249 : vector<1x32xf32> to vector<8x32xf32>
    %251 = arith.addf %247, %250 : vector<8x32xf32>
    %252 = arith.addf %179, %251 : vector<8x32xf32>
    %c1_92 = arith.constant 1 : index
    %c0_93 = arith.constant 0 : index
    %c0_94 = arith.constant 0 : index
    %253 = vector.load %arg9[%c1_92, %c0_93, %c0_94] : memref<2x1x32xf32, #tpu.memory_space<vmem>>, vector<1x1x32xf32>
    %254 = vector.shape_cast %253 : vector<1x1x32xf32> to vector<1x32xf32>
    %c1_95 = arith.constant 1 : index
    %c0_96 = arith.constant 0 : index
    %c0_97 = arith.constant 0 : index
    %255 = vector.load %arg10[%c1_95, %c0_96, %c0_97] : memref<2x1x32xf32, #tpu.memory_space<vmem>>, vector<1x1x32xf32>
    %256 = vector.shape_cast %255 : vector<1x1x32xf32> to vector<1x32xf32>
    %cst_98 = arith.constant dense<0.000000e+00> : vector<8xf32>
    %257 = vector.multi_reduction <add>, %252, %cst_98 [1] : vector<8x32xf32> to vector<8xf32>
    %258 = vector.shape_cast %257 : vector<8xf32> to vector<8x1xf32>
    %cst_99 = arith.constant 3.200000e+01 : f32
    %259 = vector.broadcast %cst_99 : f32 to vector<8x1xf32>
    %260 = arith.divf %258, %259 : vector<8x1xf32>
    %261 = vector.broadcast %260 : vector<8x1xf32> to vector<8x32xf32>
    %262 = arith.subf %252, %261 : vector<8x32xf32>
    %263 = arith.mulf %262, %262 : vector<8x32xf32>
    %cst_100 = arith.constant dense<0.000000e+00> : vector<8xf32>
    %264 = vector.multi_reduction <add>, %263, %cst_100 [1] : vector<8x32xf32> to vector<8xf32>
    %265 = vector.shape_cast %264 : vector<8xf32> to vector<8x1xf32>
    %cst_101 = arith.constant 3.200000e+01 : f32
    %266 = vector.broadcast %cst_101 : f32 to vector<8x1xf32>
    %267 = arith.divf %265, %266 : vector<8x1xf32>
    %268 = vector.broadcast %260 : vector<8x1xf32> to vector<8x32xf32>
    %269 = arith.subf %252, %268 : vector<8x32xf32>
    %cst_102 = arith.constant 9.99999996E-13 : f32
    %270 = vector.broadcast %cst_102 : f32 to vector<8x1xf32>
    %271 = arith.addf %267, %270 : vector<8x1xf32>
    %272 = math.rsqrt %271 : vector<8x1xf32>
    %273 = vector.broadcast %272 : vector<8x1xf32> to vector<8x32xf32>
    %274 = arith.mulf %269, %273 : vector<8x32xf32>
    %275 = vector.broadcast %254 : vector<1x32xf32> to vector<8x32xf32>
    %276 = arith.mulf %274, %275 : vector<8x32xf32>
    %277 = vector.broadcast %256 : vector<1x32xf32> to vector<8x32xf32>
    %278 = arith.addf %276, %277 : vector<8x32xf32>
    %279 = arith.truncf %278 : vector<8x32xf32> to vector<8x32xbf16>
    %c1_103 = arith.constant 1 : index
    %c0_104 = arith.constant 0 : index
    %c0_105 = arith.constant 0 : index
    %280 = vector.load %arg11[%c1_103, %c0_104, %c0_105] : memref<2x32x64xbf16, #tpu.memory_space<vmem>>, vector<1x32x64xbf16>
    %281 = vector.shape_cast %280 : vector<1x32x64xbf16> to vector<32x64xbf16>
    %cst_106 = arith.constant dense<0.000000e+00> : vector<8x64xf32>
    %282 = tpu.matmul %279, %281, %cst_106 {dimension_numbers = #tpu.dot_dimension_numbers<[1], [0], [0], [1], [0, 0, 1, 1], [], []>} : vector<8x32xbf16>, vector<32x64xbf16>, vector<8x64xf32> -> vector<8x64xf32>
    %c1_107 = arith.constant 1 : index
    %c0_108 = arith.constant 0 : index
    %c0_109 = arith.constant 0 : index
    %283 = vector.load %arg12[%c1_107, %c0_108, %c0_109] : memref<2x1x64xf32, #tpu.memory_space<vmem>>, vector<1x1x64xf32>
    %284 = vector.shape_cast %283 : vector<1x1x64xf32> to vector<1x64xf32>
    %285 = vector.broadcast %284 : vector<1x64xf32> to vector<8x64xf32>
    %286 = arith.addf %282, %285 : vector<8x64xf32>
    %cst_110 = arith.constant 5.000000e-01 : f32
    %287 = vector.broadcast %cst_110 : f32 to vector<8x64xf32>
    %288 = arith.mulf %287, %286 : vector<8x64xf32>
    %cst_111 = arith.constant 4.471500e-02 : f32
    %289 = vector.broadcast %cst_111 : f32 to vector<8x64xf32>
    %290 = arith.mulf %289, %286 : vector<8x64xf32>
    %291 = arith.mulf %290, %286 : vector<8x64xf32>
    %292 = arith.mulf %291, %286 : vector<8x64xf32>
    %293 = arith.addf %286, %292 : vector<8x64xf32>
    %cst_112 = arith.constant 0.797884583 : f32
    %294 = vector.broadcast %cst_112 : f32 to vector<8x64xf32>
    %295 = arith.mulf %294, %293 : vector<8x64xf32>
    %296 = math.tanh %295 : vector<8x64xf32>
    %cst_113 = arith.constant 1.000000e+00 : f32
    %297 = vector.broadcast %cst_113 : f32 to vector<8x64xf32>
    %298 = arith.addf %297, %296 : vector<8x64xf32>
    %299 = arith.mulf %288, %298 : vector<8x64xf32>
    %300 = arith.truncf %299 : vector<8x64xf32> to vector<8x64xbf16>
    %c1_114 = arith.constant 1 : index
    %c0_115 = arith.constant 0 : index
    %c0_116 = arith.constant 0 : index
    %301 = vector.load %arg13[%c1_114, %c0_115, %c0_116] : memref<2x64x32xbf16, #tpu.memory_space<vmem>>, vector<1x64x32xbf16>
    %302 = vector.shape_cast %301 : vector<1x64x32xbf16> to vector<64x32xbf16>
    %cst_117 = arith.constant dense<0.000000e+00> : vector<8x32xf32>
    %303 = tpu.matmul %300, %302, %cst_117 {dimension_numbers = #tpu.dot_dimension_numbers<[1], [0], [0], [1], [0, 0, 1, 1], [], []>} : vector<8x64xbf16>, vector<64x32xbf16>, vector<8x32xf32> -> vector<8x32xf32>
    %c1_118 = arith.constant 1 : index
    %c0_119 = arith.constant 0 : index
    %c0_120 = arith.constant 0 : index
    %304 = vector.load %arg14[%c1_118, %c0_119, %c0_120] : memref<2x1x32xf32, #tpu.memory_space<vmem>>, vector<1x1x32xf32>
    %305 = vector.shape_cast %304 : vector<1x1x32xf32> to vector<1x32xf32>
    %306 = vector.broadcast %305 : vector<1x32xf32> to vector<8x32xf32>
    %307 = arith.addf %303, %306 : vector<8x32xf32>
    %308 = arith.addf %278, %307 : vector<8x32xf32>
    %c1_121 = arith.constant 1 : index
    %c0_122 = arith.constant 0 : index
    %c0_123 = arith.constant 0 : index
    %309 = vector.load %arg15[%c1_121, %c0_122, %c0_123] : memref<2x1x32xf32, #tpu.memory_space<vmem>>, vector<1x1x32xf32>
    %310 = vector.shape_cast %309 : vector<1x1x32xf32> to vector<1x32xf32>
    %c1_124 = arith.constant 1 : index
    %c0_125 = arith.constant 0 : index
    %c0_126 = arith.constant 0 : index
    %311 = vector.load %arg16[%c1_124, %c0_125, %c0_126] : memref<2x1x32xf32, #tpu.memory_space<vmem>>, vector<1x1x32xf32>
    %312 = vector.shape_cast %311 : vector<1x1x32xf32> to vector<1x32xf32>
    %cst_127 = arith.constant dense<0.000000e+00> : vector<8xf32>
    %313 = vector.multi_reduction <add>, %308, %cst_127 [1] : vector<8x32xf32> to vector<8xf32>
    %314 = vector.shape_cast %313 : vector<8xf32> to vector<8x1xf32>
    %cst_128 = arith.constant 3.200000e+01 : f32
    %315 = vector.broadcast %cst_128 : f32 to vector<8x1xf32>
    %316 = arith.divf %314, %315 : vector<8x1xf32>
    %317 = vector.broadcast %316 : vector<8x1xf32> to vector<8x32xf32>
    %318 = arith.subf %308, %317 : vector<8x32xf32>
    %319 = arith.mulf %318, %318 : vector<8x32xf32>
    %cst_129 = arith.constant dense<0.000000e+00> : vector<8xf32>
    %320 = vector.multi_reduction <add>, %319, %cst_129 [1] : vector<8x32xf32> to vector<8xf32>
    %321 = vector.shape_cast %320 : vector<8xf32> to vector<8x1xf32>
    %cst_130 = arith.constant 3.200000e+01 : f32
    %322 = vector.broadcast %cst_130 : f32 to vector<8x1xf32>
    %323 = arith.divf %321, %322 : vector<8x1xf32>
    %324 = vector.broadcast %316 : vector<8x1xf32> to vector<8x32xf32>
    %325 = arith.subf %308, %324 : vector<8x32xf32>
    %cst_131 = arith.constant 9.99999996E-13 : f32
    %326 = vector.broadcast %cst_131 : f32 to vector<8x1xf32>
    %327 = arith.addf %323, %326 : vector<8x1xf32>
    %328 = math.rsqrt %327 : vector<8x1xf32>
    %329 = vector.broadcast %328 : vector<8x1xf32> to vector<8x32xf32>
    %330 = arith.mulf %325, %329 : vector<8x32xf32>
    %331 = vector.broadcast %310 : vector<1x32xf32> to vector<8x32xf32>
    %332 = arith.mulf %330, %331 : vector<8x32xf32>
    %333 = vector.broadcast %312 : vector<1x32xf32> to vector<8x32xf32>
    %334 = arith.addf %332, %333 : vector<8x32xf32>
    %335 = vector.extract_strided_slice %334 {offsets = [0, 0], sizes = [1, 32], strides = [1, 1]} : vector<8x32xf32> to vector<1x32xf32>
    %336 = arith.truncf %335 : vector<1x32xf32> to vector<1x32xbf16>
    %c0_132 = arith.constant 0 : index
    %c0_133 = arith.constant 0 : index
    %337 = vector.load %arg17[%c0_132, %c0_133] : memref<32x32xbf16, #tpu.memory_space<vmem>>, vector<32x32xbf16>
    %cst_134 = arith.constant dense<0.000000e+00> : vector<1x32xf32>
    %338 = tpu.matmul %336, %337, %cst_134 {dimension_numbers = #tpu.dot_dimension_numbers<[1], [0], [0], [1], [0, 0, 1, 1], [], []>} : vector<1x32xbf16>, vector<32x32xbf16>, vector<1x32xf32> -> vector<1x32xf32>
    %c0_135 = arith.constant 0 : index
    %c0_136 = arith.constant 0 : index
    %339 = vector.load %arg18[%c0_135, %c0_136] : memref<1x32xf32, #tpu.memory_space<vmem>>, vector<1x32xf32>
    %340 = arith.addf %338, %339 : vector<1x32xf32>
    %341 = math.tanh %340 : vector<1x32xf32>
    %342 = arith.truncf %341 : vector<1x32xf32> to vector<1x32xbf16>
    %c0_137 = arith.constant 0 : index
    %c0_138 = arith.constant 0 : index
    %343 = vector.load %arg19[%c0_137, %c0_138] : memref<32x2xbf16, #tpu.memory_space<vmem>>, vector<32x2xbf16>
    %cst_139 = arith.constant dense<0.000000e+00> : vector<1x2xf32>
    %344 = tpu.matmul %342, %343, %cst_139 {dimension_numbers = #tpu.dot_dimension_numbers<[1], [0], [0], [1], [0, 0, 1, 1], [], []>} : vector<1x32xbf16>, vector<32x2xbf16>, vector<1x2xf32> -> vector<1x2xf32>
    %c0_140 = arith.constant 0 : index
    %c0_141 = arith.constant 0 : index
    %345 = vector.load %arg20[%c0_140, %c0_141] : memref<1x2xf32, #tpu.memory_space<vmem>>, vector<1x2xf32>
    %346 = arith.addf %344, %345 : vector<1x2xf32>
    %cst_142 = arith.constant dense<0xFF800000> : vector<1xf32>
    %347 = vector.multi_reduction <maximumf>, %346, %cst_142 [1] : vector<1x2xf32> to vector<1xf32>
    %348 = vector.shape_cast %347 : vector<1xf32> to vector<1x1xf32>
    %349 = vector.broadcast %348 : vector<1x1xf32> to vector<1x2xf32>
    %350 = arith.subf %346, %349 : vector<1x2xf32>
    %351 = math.exp %350 : vector<1x2xf32>
    %cst_143 = arith.constant dense<0.000000e+00> : vector<1xf32>
    %352 = vector.multi_reduction <add>, %351, %cst_143 [1] : vector<1x2xf32> to vector<1xf32>
    %353 = vector.shape_cast %352 : vector<1xf32> to vector<1x1xf32>
    %354 = vector.broadcast %353 : vector<1x1xf32> to vector<1x2xf32>
    %355 = arith.divf %351, %354 : vector<1x2xf32>
    %cst_144 = arith.constant 0.000000e+00 : f32
    %356 = vector.broadcast %cst_144 : f32 to vector<1x118xf32>
    %357 = tpu.concatenate %355, %233, %356 in 1 : vector<1x2xf32>, vector<1x8xf32>, vector<1x118xf32> -> vector<1x128xf32>
    %c0_145 = arith.constant 0 : index
    %c0_146 = arith.constant 0 : index
    %c0_147 = arith.constant 0 : index
    %358 = vector.load %arg21[%c0_145, %c0_146, %c0_147] : memref<1x1x128xf32, #tpu.memory_space<vmem>>, vector<1x1x128xf32>
    %359 = vector.shape_cast %358 : vector<1x1x128xf32> to vector<1x128xf32>
    %360 = vector.shape_cast %357 : vector<1x128xf32> to vector<1x1x128xf32>
    tpu.vector_store %arg21[%c0_145, %c0_146, %c0_147], %360 {strides = array<i32>} : memref<1x1x128xf32, #tpu.memory_space<vmem>>, vector<1x1x128xf32>,
    return
  }
  func.func @transform_0(%arg0: i32) -> (i32, i32, i32) {
    %c0_i32 = arith.constant 0 : i32
    %c0_i32_0 = arith.constant 0 : i32
    %c0_i32_1 = arith.constant 0 : i32
    return %arg0, %c0_i32, %c0_i32_0 : i32, i32, i32
  }
  func.func @transform_1(%arg0: i32) -> (i32, i32, i32) {
    %c0_i32 = arith.constant 0 : i32
    %c0_i32_0 = arith.constant 0 : i32
    %c0_i32_1 = arith.constant 0 : i32
    return %arg0, %c0_i32, %c0_i32_0 : i32, i32, i32
  }
  func.func @transform_2(%arg0: i32) -> (i32, i32) {
    %c0_i32 = arith.constant 0 : i32
    %c0_i32_0 = arith.constant 0 : i32
    %c0_i32_1 = arith.constant 0 : i32
    return %c0_i32, %c0_i32_0 : i32, i32
  }
  func.func @transform_3(%arg0: i32) -> (i32, i32) {
    %c0_i32 = arith.constant 0 : i32
    %c0_i32_0 = arith.constant 0 : i32
    %c0_i32_1 = arith.constant 0 : i32
    return %c0_i32, %c0_i32_0 : i32, i32
  }
  func.func @transform_4(%arg0: i32) -> (i32, i32, i32) {
    %c0_i32 = arith.constant 0 : i32
    %c0_i32_0 = arith.constant 0 : i32
    %c0_i32_1 = arith.constant 0 : i32
    %c0_i32_2 = arith.constant 0 : i32
    return %c0_i32, %c0_i32_0, %c0_i32_1 : i32, i32, i32
  }
  func.func @transform_5(%arg0: i32) -> (i32, i32, i32) {
    %c0_i32 = arith.constant 0 : i32
    %c0_i32_0 = arith.constant 0 : i32
    %c0_i32_1 = arith.constant 0 : i32
    %c0_i32_2 = arith.constant 0 : i32
    return %c0_i32, %c0_i32_0, %c0_i32_1 : i32, i32, i32
  }
  func.func @transform_6(%arg0: i32) -> (i32, i32, i32) {
    %c0_i32 = arith.constant 0 : i32
    %c0_i32_0 = arith.constant 0 : i32
    %c0_i32_1 = arith.constant 0 : i32
    %c0_i32_2 = arith.constant 0 : i32
    return %c0_i32, %c0_i32_0, %c0_i32_1 : i32, i32, i32
  }
  func.func @transform_7(%arg0: i32) -> (i32, i32, i32) {
    %c0_i32 = arith.constant 0 : i32
    %c0_i32_0 = arith.constant 0 : i32
    %c0_i32_1 = arith.constant 0 : i32
    %c0_i32_2 = arith.constant 0 : i32
    return %c0_i32, %c0_i32_0, %c0_i32_1 : i32, i32, i32
  }
  func.func @transform_8(%arg0: i32) -> (i32, i32, i32) {
    %c0_i32 = arith.constant 0 : i32
    %c0_i32_0 = arith.constant 0 : i32
    %c0_i32_1 = arith.constant 0 : i32
    %c0_i32_2 = arith.constant 0 : i32
    return %c0_i32, %c0_i32_0, %c0_i32_1 : i32, i32, i32
  }
  func.func @transform_9(%arg0: i32) -> (i32, i32, i32) {
    %c0_i32 = arith.constant 0 : i32
    %c0_i32_0 = arith.constant 0 : i32
    %c0_i32_1 = arith.constant 0 : i32
    %c0_i32_2 = arith.constant 0 : i32
    return %c0_i32, %c0_i32_0, %c0_i32_1 : i32, i32, i32
  }
  func.func @transform_10(%arg0: i32) -> (i32, i32, i32) {
    %c0_i32 = arith.constant 0 : i32
    %c0_i32_0 = arith.constant 0 : i32
    %c0_i32_1 = arith.constant 0 : i32
    %c0_i32_2 = arith.constant 0 : i32
    return %c0_i32, %c0_i32_0, %c0_i32_1 : i32, i32, i32
  }
  func.func @transform_11(%arg0: i32) -> (i32, i32, i32) {
    %c0_i32 = arith.constant 0 : i32
    %c0_i32_0 = arith.constant 0 : i32
    %c0_i32_1 = arith.constant 0 : i32
    %c0_i32_2 = arith.constant 0 : i32
    return %c0_i32, %c0_i32_0, %c0_i32_1 : i32, i32, i32
  }
  func.func @transform_12(%arg0: i32) -> (i32, i32, i32) {
    %c0_i32 = arith.constant 0 : i32
    %c0_i32_0 = arith.constant 0 : i32
    %c0_i32_1 = arith.constant 0 : i32
    %c0_i32_2 = arith.constant 0 : i32
    return %c0_i32, %c0_i32_0, %c0_i32_1 : i32, i32, i32
  }
  func.func @transform_13(%arg0: i32) -> (i32, i32, i32) {
    %c0_i32 = arith.constant 0 : i32
    %c0_i32_0 = arith.constant 0 : i32
    %c0_i32_1 = arith.constant 0 : i32
    %c0_i32_2 = arith.constant 0 : i32
    return %c0_i32, %c0_i32_0, %c0_i32_1 : i32, i32, i32
  }
  func.func @transform_14(%arg0: i32) -> (i32, i32, i32) {
    %c0_i32 = arith.constant 0 : i32
    %c0_i32_0 = arith.constant 0 : i32
    %c0_i32_1 = arith.constant 0 : i32
    %c0_i32_2 = arith.constant 0 : i32
    return %c0_i32, %c0_i32_0, %c0_i32_1 : i32, i32, i32
  }
  func.func @transform_15(%arg0: i32) -> (i32, i32, i32) {
    %c0_i32 = arith.constant 0 : i32
    %c0_i32_0 = arith.constant 0 : i32
    %c0_i32_1 = arith.constant 0 : i32
    %c0_i32_2 = arith.constant 0 : i32
    return %c0_i32, %c0_i32_0, %c0_i32_1 : i32, i32, i32
  }
  func.func @transform_16(%arg0: i32) -> (i32, i32) {
    %c0_i32 = arith.constant 0 : i32
    %c0_i32_0 = arith.constant 0 : i32
    %c0_i32_1 = arith.constant 0 : i32
    return %c0_i32, %c0_i32_0 : i32, i32
  }
  func.func @transform_17(%arg0: i32) -> (i32, i32) {
    %c0_i32 = arith.constant 0 : i32
    %c0_i32_0 = arith.constant 0 : i32
    %c0_i32_1 = arith.constant 0 : i32
    return %c0_i32, %c0_i32_0 : i32, i32
  }
  func.func @transform_18(%arg0: i32) -> (i32, i32) {
    %c0_i32 = arith.constant 0 : i32
    %c0_i32_0 = arith.constant 0 : i32
    %c0_i32_1 = arith.constant 0 : i32
    return %c0_i32, %c0_i32_0 : i32, i32
  }
  func.func @transform_19(%arg0: i32) -> (i32, i32) {
    %c0_i32 = arith.constant 0 : i32
    %c0_i32_0 = arith.constant 0 : i32
    %c0_i32_1 = arith.constant 0 : i32
    return %c0_i32, %c0_i32_0 : i32, i32
  }
  func.func @transform_20(%arg0: i32) -> (i32, i32, i32) {
    %c0_i32 = arith.constant 0 : i32
    %c0_i32_0 = arith.constant 0 : i32
    %c0_i32_1 = arith.constant 0 : i32
    return %arg0, %c0_i32, %c0_i32_0 : i32, i32, i32
  }
}

</mosaic_0001>

<bundles_post_ra>
// kernel: bert_forward.1
= control target key start
LH: loop header
LB: loop body
LE: loop exit
PB: predicated region body
PF: predicated region fallthrough
CT: control target
= control target key end

     0   :  { %s3941_s0 = inlined_call_operand.vmem [shape: f32[2,8,32], index: 0, kind: input, shape index: {}]   ;;  %s3942_s1 = inlined_call_operand.vmem [shape: f32[2,1,8], index: 1, kind: input, shape index: {}]   ;;  %s3943_s2 = inlined_call_operand.vmem [shape: f32[1,32], index: 2, kind: input, shape index: {}]   ;;  %s3944_s3 = inlined_call_operand.vmem [shape: f32[1,32], index: 3, kind: input, shape index: {}]   ;;  %s3945_s4 = inlined_call_operand.vmem [shape: bf16[2,32,96], index: 4, kind: input, shape index: {}]   ;;  %s3946_s5 = inlined_call_operand.vmem [shape: f32[2,1,96], index: 5, kind: input, shape index: {}]   ;;  %s3947_s6 = inlined_call_operand.vmem [shape: bf16[2,32,32], index: 6, kind: input, shape index: {}]   ;;  %s3948_s7 = inlined_call_operand.vmem [shape: f32[2,1,32], index: 7, kind: input, shape index: {}]   ;;  %s3949_s8 = inlined_call_operand.vmem [shape: f32[2,1,32], index: 8, kind: input, shape index: {}]   ;;  %s3950_s9 = inlined_call_operand.vmem [shape: f32[2,1,32], index: 9, kind: input, shape index: {}]   ;;  %s3951_s10 = inlined_call_operand.vmem [shape: bf16[2,32,64], index: 10, kind: input, shape index: {}]   ;;  %s3952_s11 = inlined_call_operand.vmem [shape: f32[2,1,64], index: 11, kind: input, shape index: {}]   ;;  %s3953_s12 = inlined_call_operand.vmem [shape: bf16[2,64,32], index: 12, kind: input, shape index: {}]   ;;  %s3954_s13 = inlined_call_operand.vmem [shape: f32[2,1,32], index: 13, kind: input, shape index: {}]   ;;  %s3955_s14 = inlined_call_operand.vmem [shape: f32[2,1,32], index: 14, kind: input, shape index: {}]   ;;  %s3956_s15 = inlined_call_operand.vmem [shape: f32[2,1,32], index: 15, kind: input, shape index: {}]   ;;  %s3957_s16 = inlined_call_operand.vmem [shape: bf16[32,32], index: 16, kind: input, shape index: {}]   ;;  %s3958_s17 = inlined_call_operand.vmem [shape: f32[1,32], index: 17, kind: input, shape index: {}]   ;;  %s3959_s18 = inlined_call_operand.vmem [shape: bf16[32,2], index: 18, kind: input, shape index: {}]   ;;  %s3960_s19 = inlined_call_operand.vmem [shape: f32[1,2], index: 19, kind: input, shape index: {}]   ;;  %s3961_s20 = inlined_call_operand.vmem [shape: f32[2,1,128], index: 20, kind: output, shape index: {}]  }
   0x1   :  { %3968 = sst [smem:[#allocation2_spill]] %s3941_s0 }
   0x2   :  { %3969 = sst [smem:[#allocation3_spill]] %s3942_s1  ;;  %s3538_s1 = smov 0  }
   0x3   :  { %3970 = sst [smem:[#allocation4_spill]] %s3943_s2 }
   0x4   :  { %3971 = sst [smem:[#allocation5_spill]] %s3944_s3 }
   0x5   :  { %3972 = sst [smem:[#allocation6_spill]] %s3945_s4 }
   0x6 LB: > { %s2972_s22 = sadd.s32 4294967295, %s3420_s1   ;;  %p2976_p0 = scmp.ge.s32.totalorder %s3420_s1, 1  ;;  %s3420_s1 = sphi %s3538_s1, %s30_s1  }
   0x7   : > { %p569_p1 = scmp.lt.s32.totalorder %s3420_s1, 3 }
   0x9   : > { %p570_p2 = pnand %p2976_p0, %p569_p1 }
   0xa   : > { %p627_p3 = scmp.lt.s32.totalorder (!%p570_p2), %s2972_s22, 1  ;;  %s3973_s25 = sld [smem:[#allocation2_spill]] (!%p570_p2) }
   0xb   : > { %573 = sbr.rel (%p570_p2) target bundleno = 6038 (0x1796), region = 100  ;;  %s3974_s28 = sld [smem:[#allocation6_spill]] (!%p570_p2) }
   0xc   : > { %s3975_s21 = sld [smem:[#allocation4_spill]] (!%p570_p2)  ;;  %s3424_s26 = smov (!%p570_p2), 104  }
   0xd   : > { %s3976_s2 = sld [smem:[#allocation5_spill]] (!%p570_p2)  ;;  %s3425_s27 = smov (!%p570_p2), 120  }
   0xe   : > { %s3426_s4 = smov (!%p570_p2), 112   ;;  %s3427_s29 = smov (!%p570_p2), 96  }
   0xf   : > { %s3966_s24 = smov (!%p570_p2), 64   ;;  %s3964_s0 = smov (!%p570_p2), 8  }
  0x10   : > { %s3983_s22 = smov (!%p627_p3, %s2972_s22), 1  ;;  %vm641_vm0 = vcmask 261120   ;;  %v3422_v8 = vmov 0.0   ;;  %vm3423_vm1 = vmmov 0   ;;  %v2980_v20 = vld [vmem:[%s3946_s5] ss:$0 sm:$0xff] }
  0x11   : > { %s2977_s23 = sshll.u32 %s3983_s22, 3  ;;  %v3338_v7 = vld [vmem:[%s3974_s28 + $0x8] sm:$0xff]   ;;  %3151 = vmatprep.subr.bf16.mxu0 %v3422_v8  ;;  %3155 = vmatprep.mubr.msk.bf16.mxu0 %vm3423_vm1, %v3422_v8  ;;  %v3339_v9 = vld [vmem:[%s3974_s28] sm:$0xff]   ;;  %vm747_vm2 = vcmask 64512   ;;  %vm1425_vm3 = vcmask 130048   ;;  %vm1427_vm4 = vcmask 195584  }
  0x12   : > { %s630_s3 = scalar_lea.vmem %s3973_s25, %s2977_s23  ;;  %3152 = vmatpush3.bf16.msra.mxu0 %v3338_v7  ;;  %3159 = vmatprep.subr.mxu1 %v3422_v8  ;;  %v2978_v14 = vld [vmem:[%s3975_s21] ss:$0 sm:$0xff]  ;;  %s3977_s21 = sld [smem:[#allocation3_spill]]  ;;  %vm1642_vm5 = vcmask 523264   ;;  %vm2148_vm6 = vcmask 57344   ;;  %vm2895_vm7 = vcmask 8192  }
  0x13   : > { %v638_v0 = vld [vmem:[%s630_s3] sm:$0xff]  ;;  %3153 = vmatprep.subr.bf16.mxu0 %v3422_v8  ;;  %3161 = vmatprep.mubr.msk.f32.mxu1 %vm3423_vm1, %v3422_v8  ;;  %s3979_s30 = smov 16   ;;  %s3981_s25 = smov 24   ;;  %vm2911_vm8 = vcmask 15360   ;;  %vm2913_vm9 = vcmask 80896  }
  0x14   : > { %v642_v1 = vsel %vm641_vm0, %v638_v0, 0.0  ;;  %v2979_v16 = vld [vmem:[%s3976_s2] ss:$0 sm:$0xff]  ;;  %s3980_s2 = smov 8  }
  0x15   : > { %643 = vadd.xlane.f32.xlu0 %v642_v1 }
  0x16   : > { %3154 = vmatpush3.bf16.msra.mxu0 %v3339_v9 }
  0x17   : > { %3174 = vmatprep.subr.mxu0 %v3422_v8 }
  0x18   : > { %s633_s23 = scalar_lea.vmem %s3977_s21, %s3983_s22  ;;  %s3965_s21 = smov 16  }
  0x19   : > { %v3630_v33 = vld [vmem:[%s633_s23] ss:$0 sm:$0xff]  ;;  %s3963_s23 = smov 24  }
  0x9e   : > { %v644_v2 = vpop.xlane.xlu0 %643 }
  0x9f   : > { %v646_v3 = vmul.f32 0.03125, %v644_v2 }
  0xa1   : > { %v647_v4 = vsub.f32 %v638_v0, %v646_v3 }
  0xa3   : > { %v648_v5 = vmul.f32 %v647_v4, %v647_v4 }
  0xa5   : > { %v649_v6 = vsel %vm641_vm0, %v648_v5, 0.0 }
  0xa6   : > { %650 = vadd.xlane.f32.xlu0 %v649_v6 }
 0x12f   : > { %v651_v10 = vpop.xlane.xlu0 %650 }
 0x130   : > { %v652_v11 = vmul.f32 0.03125, %v651_v10 }
 0x132   : > { %v653_v12 = vadd.f32 1e-12, %v652_v11 }
 0x134   : > { %3362 = vrsqrt.f32 %v653_v12 }
 0x141   : > { %v3363_v13 = vpop.eup %3362 }
 0x142   : > { %v655_v15 = vmul.f32 %v3363_v13, %v647_v4 }
 0x144   : > { %v662_v17 = vmul.f32 %v2978_v14, %v655_v15 }
 0x146   : > { %v3574_v18 = vadd.f32 %v2979_v16, %v662_v17 }
 0x148   : > { %v671_v19 = vpack.c.bf16 %v3574_v18, %v3574_v18 }
 0x14a   : > { %3156 = vmatmul.mubr.msk.bf16.vlgmr.msra.gmra.mxu0 %vm641_vm0, %v671_v19 }
 0x14b   : > { %3176 = vmatprep.mubr.msk.f32.mxu0 %vm3423_vm1, %v3422_v8 }
 0x20a   : > { %v732_v21 = vpop.f32.mrf.mxu0 }
 0x20b   : > { %v3584_v22 = vadd.f32 %v2980_v20, %v732_v21 }
 0x20c   : > { %v3157_v23 = vpop.f32.mrf.mxu0 }
 0x20d   : > { %743 = vrot.lane.b32.xlu0 %v3584_v22, %s3424_s26  ;;  %739 = vrot.lane.b32.xlu1 %v3584_v22, %s3425_s27 }
 0x20e   : > { %v735_v24 = vpop.f32.mrf.mxu0 }
 0x210   : > { %v3158_v25 = vpop.f32.mrf.mxu0 }
 0x211   : > { %741 = vrot.lane.b32.xlu1 %v3584_v22, %s3426_s4 }
 0x215   : > { %745 = vrot.lane.b32.xlu1 %v3584_v22, %s3427_s29 }
 0x27f   : > { %v3594_v26 = vpop.permute.xlu1 %739  ;;  %v3599_v28 = vpop.permute.xlu0 %743 }
 0x280   : > { %822 = vrot.lane.b32.xlu1 %v3594_v26, %s3427_s29 }
 0x283   : > { %v742_v27 = vpop.permute.xlu1 %741 }
 0x284   : > { %898 = vrot.lane.b32.xlu1 %v742_v27, %s3427_s29 }
 0x287   : > { %v746_v29 = vpop.permute.xlu1 %745 }
 0x288   : > { %974 = vrot.lane.b32.xlu1 %v3599_v28, %s3427_s29  ;;  %3160 = vmatpush3.xpose.msk.msra.mxu1 %vm747_vm2, %v746_v29 }
 0x289   : > { %3164 = vmatprep.subr.mxu1 %v3422_v8 }
 0x28b   : > { %3162 = vmatmul.mubr.msk.f32.vlgmr.msra.gmra.mxu1 %vm747_vm2, %v3584_v22 }
 0x28c   : > { %3166 = vmatprep.mubr.msk.f32.mxu1 %vm3423_vm1, %v3422_v8 }
 0x2f2   : > { %v823_v30 = vpop.permute.xlu1 %822 }
 0x2f3   : > { %3165 = vmatpush3.xpose.msk.msra.mxu1 %vm747_vm2, %v823_v30  ;;  %v3340_v30 = vld [vmem:[%s3947_s6 + $0x8] sm:$0xff]  }
 0x2f4   : > { %3169 = vmatprep.subr.mxu1 %v3422_v8 }
 0x2f6   : > { %3167 = vmatmul.mubr.msk.f32.vlgmr.msra.gmra.mxu1 %vm747_vm2, %v3594_v26  ;;  %v899_v31 = vpop.permute.xlu1 %898 }
 0x2f7   : > { %3170 = vmatpush3.xpose.msk.msra.mxu1 %vm747_vm2, %v899_v31  ;;  %3171 = vmatprep.mubr.msk.f32.mxu1 %vm3423_vm1, %v3422_v8  ;;  %v3341_v31 = vld [vmem:[%s3947_s6] sm:$0xff]  }
 0x2f8   : > { %3179 = vmatprep.subr.mxu1 %v3422_v8 }
 0x2fa   : > { %3172 = vmatmul.mubr.msk.f32.vlgmr.msra.gmra.mxu1 %vm747_vm2, %v742_v27  ;;  %v975_v32 = vpop.permute.xlu1 %974 }
 0x2fb   : > { %3175 = vmatpush3.xpose.msk.msra.mxu0 %vm747_vm2, %v975_v32  ;;  %3181 = vmatprep.mubr.msk.f32.mxu1 %vm3423_vm1, %v3422_v8 }
 0x2fc   : > { %3184 = vmatprep.subr.mxu0 %v3422_v8 }
 0x2fe   : > { %3177 = vmatmul.mubr.msk.f32.vlgmr.msra.gmra.mxu0 %vm747_vm2, %v3599_v28 }
 0x2ff   : > { %3186 = vmatprep.mubr.msk.f32.mxu0 %vm3423_vm1, %v3422_v8 }
 0x34b   : > { %v818_v34 = vpop.f32.mrf.mxu1 }
 0x34c   : > { %v1050_v35 = vmul.f32 0.35355338, %v818_v34 }
 0x34d   : > { %v3163_v36 = vpop.f32.mrf.mxu1 }
 0x34e   : > { %v1060_v37 = vadd.f32 %v3630_v33, %v1050_v35 }
 0x350   : > { %v1064_v38 = vsel %vm747_vm2, %v1060_v37, -inf }
 0x351   : > { %1065 = vmax.xlane.f32.xlu1 %v1064_v38 }
 0x3b6   : > { %v894_v39 = vpop.f32.mrf.mxu1 }
 0x3b7   : > { %v1051_v40 = vmul.f32 0.35355338, %v894_v39 }
 0x3b8   : > { %v3168_v41 = vpop.f32.mrf.mxu1 }
 0x3b9   : > { %v1061_v42 = vadd.f32 %v3630_v33, %v1051_v40 }
 0x3ba   : > { %v970_v43 = vpop.f32.mrf.mxu1 }
 0x3bb   : > { %v1052_v44 = vmul.f32 0.35355338, %v970_v43  ;;  %v1067_v45 = vsel %vm747_vm2, %v1061_v42, -inf }
 0x3bc   : > { %1068 = vmax.xlane.f32.xlu0 %v1067_v45  ;;  %v3173_v46 = vpop.f32.mrf.mxu1 }
 0x3bd   : > { %v1062_v47 = vadd.f32 %v3630_v33, %v1052_v44  ;;  %v2997_v46 = vld [vmem:[%s3948_s7] ss:$0 sm:$0xff] }
 0x3be   : > { %v1046_v48 = vpop.f32.mrf.mxu0 }
 0x3bf   : > { %v1053_v49 = vmul.f32 0.35355338, %v1046_v48  ;;  %v1070_v50 = vsel %vm747_vm2, %v1062_v47, -inf }
 0x3c0   : > { %1071 = vmax.xlane.f32.xlu1 %v1070_v50  ;;  %v3178_v51 = vpop.f32.mrf.mxu0 }
 0x3c1   : > { %v1063_v52 = vadd.f32 %v3630_v33, %v1053_v49 }
 0x3c3   : > { %v1073_v53 = vsel %vm747_vm2, %v1063_v52, -inf }
 0x3c4   : > { %1074 = vmax.xlane.f32.xlu0 %v1073_v53 }
 0x3d1   : > { %1108 = vrot.lane.b32.xlu1 %v3584_v22, %s3966_s24 }
 0x3da   : > { %v1066_v54 = vpop.xlane.xlu1 %1065 }
 0x3db   : > { %v1076_v55 = vsub.f32 %v1060_v37, %v1066_v54 }
 0x3dd   : > { %v1080_v56 = vmul.f32 1.442695, %v1076_v55 }
 0x3df   : > { %3364 = vpow2.f32 %v1080_v56 }
 0x3ec   : > { %v3365_v57 = vpop.eup %3364 }
 0x3ed   : > { %v1088_v58 = vsel %vm747_vm2, %v3365_v57, 0.0 }
 0x3f5   : > { %1089 = vadd.xlane.f32.xlu1 %v1088_v58 }
 0x406   : > { %1260 = vrot.lane.b32.xlu1 %v742_v27, %s3966_s24 }
 0x445   : > { %v1069_v59 = vpop.xlane.xlu0 %1068 }
 0x446   : > { %v1077_v60 = vsub.f32 %v1061_v42, %v1069_v59  ;;  %v3342_v59 = vld [vmem:[%s3951_s10 + $0x8] sm:$0xff]  }
 0x448   : > { %v1082_v61 = vmul.f32 1.442695, %v1077_v60 }
 0x449   : > { %v1072_v62 = vpop.xlane.xlu1 %1071 }
 0x44a   : > { %3366 = vpow2.f32 %v1082_v61  ;;  %v1078_v63 = vsub.f32 %v1062_v47, %v1072_v62 }
 0x44c   : > { %v1084_v0 = vmul.f32 1.442695, %v1078_v63 }
 0x44d   : > { %v1109_v1 = vpop.permute.xlu1 %1108  ;;  %v1075_v2 = vpop.xlane.xlu0 %1074 }
 0x44e   : > { %3368 = vpow2.f32 %v1084_v0  ;;  %v1079_v3 = vsub.f32 %v1063_v52, %v1075_v2  ;;  %3180 = vmatpush3.msra.mxu1 %v1109_v1  ;;  %v3001_v0 = vld [vmem:[%s3949_s8] ss:$0 sm:$0xff] }
 0x44f   : > { %3189 = vmatprep.subr.mxu1 %v3422_v8  ;;  %v3002_v2 = vld [vmem:[%s3950_s9] ss:$0 sm:$0xff] }
 0x450   : > { %v1086_v4 = vmul.f32 1.442695, %v1079_v3 }
 0x452   : > { %3370 = vpow2.f32 %v1086_v4 }
 0x457   : > { %v3367_v5 = vpop.eup %3366 }
 0x458   : > { %v1091_v6 = vsel %vm747_vm2, %v3367_v5, 0.0 }
 0x459   : > { %1092 = vadd.xlane.f32.xlu0 %v1091_v6  ;;  %v3344_v6 = vld [vmem:[%s3953_s12 + $0x18] sm:$0xff]  }
 0x45b   : > { %v3369_v7 = vpop.eup %3368 }
 0x45c   : > { %v1094_v9 = vsel %vm747_vm2, %v3369_v7, 0.0 }
 0x45d   : > { %1095 = vadd.xlane.f32.xlu1 %v1094_v9  ;;  %v3346_v9 = vld [vmem:[%s3953_s12 + $0x8] sm:$0xff]  }
 0x45f   : > { %v3371_v10 = vpop.eup %3370 }
 0x460   : > { %v1097_v11 = vsel %vm747_vm2, %v3371_v10, 0.0 }
 0x461   : > { %1098 = vadd.xlane.f32.xlu0 %v1097_v11  ;;  %v3003_v11 = vld [vmem:[%s3952_s11] ss:$0 sm:$0xff] }
 0x46e   : > { %1336 = vrot.lane.b32.xlu1 %v3599_v28, %s3966_s24 }
 0x477   : > { %1184 = vrot.lane.b32.xlu0 %v3594_v26, %s3966_s24 }
 0x47e   : > { %v1090_v12 = vpop.xlane.xlu1 %1089 }
 0x47f   : > { %3372 = vrcp.f32 %v1090_v12 }
 0x482   : > { %v1261_v15 = vpop.permute.xlu1 %1260 }
 0x48c   : > { %v3373_v13 = vpop.eup %3372 }
 0x48d   : > { %v1104_v14 = vmul.f32 %v3373_v13, %v3365_v57 }
 0x48f   : > { %3182 = vmatmul.mubr.msk.f32.vlgmr.msra.gmra.mxu1 %vm747_vm2, %v1104_v14 }
 0x490   : > { %3190 = vmatpush3.msra.mxu1 %v1261_v15  ;;  %3191 = vmatprep.mubr.msk.f32.mxu1 %vm3423_vm1, %v3422_v8 }
 0x491   : > { %3199 = vmatprep.subr.bf16.mxu1 %v3422_v8 }
 0x4e2   : > { %v1093_v16 = vpop.xlane.xlu0 %1092 }
 0x4e3   : > { %3374 = vrcp.f32 %v1093_v16 }
 0x4e6   : > { %v1096_v17 = vpop.xlane.xlu1 %1095 }
 0x4e7   : > { %3376 = vrcp.f32 %v1096_v17 }
 0x4ea   : > { %v1099_v19 = vpop.xlane.xlu0 %1098  ;;  %v1337_v23 = vpop.permute.xlu1 %1336 }
 0x4eb   : > { %3378 = vrcp.f32 %v1099_v19 }
 0x4ee   : > { %v1185_v20 = vpop.permute.xlu0 %1184 }
 0x4ef   : > { %3185 = vmatpush3.msra.mxu0 %v1185_v20 }
 0x4f0   : > { %v3375_v21 = vpop.eup %3374  ;;  %3194 = vmatprep.subr.mxu0 %v3422_v8 }
 0x4f1   : > { %v1105_v22 = vmul.f32 %v3375_v21, %v3367_v5 }
 0x4f3   : > { %3187 = vmatmul.mubr.msk.f32.vlgmr.msra.gmra.mxu0 %vm747_vm2, %v1105_v22 }
 0x4f4   : > { %v3377_v24 = vpop.eup %3376  ;;  %3195 = vmatpush3.msra.mxu0 %v1337_v23  ;;  %3196 = vmatprep.mubr.msk.f32.mxu0 %vm3423_vm1, %v3422_v8 }
 0x4f5   : > { %v1106_v25 = vmul.f32 %v3377_v24, %v3369_v7  ;;  %3207 = vmatprep.subr.bf16.mxu0 %v3422_v8  ;;  %v3345_v7 = vld [vmem:[%s3953_s12 + $0x10] sm:$0xff]  }
 0x4f7   : > { %3192 = vmatmul.mubr.msk.f32.vlgmr.msra.gmra.mxu1 %vm747_vm2, %v1106_v25 }
 0x4f8   : > { %v3379_v26 = vpop.eup %3378  ;;  %3203 = vmatprep.mubr.msk.bf16.mxu1 %vm3423_vm1, %v3422_v8  ;;  %3200 = vmatpush3.bf16.msra.mxu1 %v3340_v30 }
 0x4f9   : > { %v1107_v27 = vmul.f32 %v3379_v26, %v3371_v10  ;;  %3201 = vmatprep.subr.bf16.mxu1 %v3422_v8  ;;  %v3347_v10 = vld [vmem:[%s3953_s12] sm:$0xff]  }
 0x4fb   : > { %3197 = vmatmul.mubr.msk.f32.vlgmr.msra.gmra.mxu0 %vm747_vm2, %v1107_v27 }
 0x4fc   : > { %3211 = vmatprep.mubr.msk.bf16.mxu0 %vm3423_vm1, %v3422_v8  ;;  %3202 = vmatpush3.bf16.msra.mxu1 %v3341_v31 }
 0x4fd   : > { %3215 = vmatprep.subr.bf16.mxu1 %v3422_v8  ;;  %3208 = vmatpush3.bf16.msra.mxu0 %v3342_v59 }
 0x4fe   : > { %3209 = vmatprep.subr.bf16.mxu0 %v3422_v8 }
 0x54f   : > { %v1180_v28 = vpop.f32.mrf.mxu1 }
 0x551   : > { %v3183_v29 = vpop.f32.mrf.mxu1 }
 0x5b3   : > { %v1256_v32 = vpop.f32.mrf.mxu0 }
 0x5b4   : > { %1413 = vrot.lane.b32.xlu0 %v1256_v32, %s3964_s0  ;;  %s3432_s0 = smov 2  }
 0x5b5   : > { %v3188_v34 = vpop.f32.mrf.mxu0 }
 0x5b7   : > { %v1332_v35 = vpop.f32.mrf.mxu1 }
 0x5b8   : > { %1417 = vrot.lane.b32.xlu1 %v1332_v35, %s3965_s21 }
 0x5b9   : > { %v3193_v36 = vpop.f32.mrf.mxu1 }
 0x5bb   : > { %v1408_v37 = vpop.f32.mrf.mxu0 }
 0x5bc   : > { %1421 = vrot.lane.b32.xlu0 %v1408_v37, %s3963_s23 }
 0x5bd   : > { %v3198_v38 = vpop.f32.mrf.mxu0 }
 0x626   : > { %v1414_v39 = vpop.permute.xlu0 %1413 }
 0x627   : > { %v1424_v41 = vsel %vm747_vm2, %v1180_v28, %v1414_v39  ;;  %v3007_v28 = vld [vmem:[%s3954_s13] ss:$0 sm:$0xff] }
 0x62a   : > { %v1418_v40 = vpop.permute.xlu1 %1417 }
 0x62b   : > { %v1426_v42 = vsel %vm1425_vm3, %v1424_v41, %v1418_v40 }
 0x62e   : > { %v1422_v43 = vpop.permute.xlu0 %1421 }
 0x62f   : > { %v1428_v44 = vsel %vm1427_vm4, %v1426_v42, %v1422_v43  ;;  %v3348_v42 = vld [vmem:[%s3974_s28 + $0x18] sm:$0xff]   ;;  %v3349_v43 = vld [vmem:[%s3974_s28 + $0x10] sm:$0xff]  }
 0x630   : > { %v1429_v45 = vpack.c.bf16 %v1428_v44, %v1428_v44 }
 0x632   : > { %3204 = vmatmul.mubr.msk.bf16.vlgmr.msra.gmra.mxu1 %vm641_vm0, %v1429_v45 }
 0x633   : > { %3223 = vmatprep.mubr.msk.bf16.mxu1 %vm3423_vm1, %v3422_v8  ;;  %3216 = vmatpush3.bf16.msra.mxu1 %v3344_v6 }
 0x634   : > { %3217 = vmatprep.subr.bf16.mxu1 %v3422_v8 }
 0x637   : > { %3218 = vmatpush3.bf16.msra.mxu1 %v3345_v7 }
 0x638   : > { %3219 = vmatprep.subr.bf16.mxu1 %v3422_v8 }
 0x63b   : > { %3220 = vmatpush3.bf16.msra.mxu1 %v3346_v9 }
 0x63c   : > { %3221 = vmatprep.subr.bf16.mxu1 %v3422_v8 }
 0x63f   : > { %3222 = vmatpush3.bf16.msra.mxu1 %v3347_v10 }
 0x640   : > { %3245 = vmatprep.subr.mxu1 %v3422_v8 }
 0x6f2   : > { %v1490_v47 = vpop.f32.mrf.mxu1 }
 0x6f3   : > { %v1491_v48 = vadd.f32 %v2997_v46, %v1490_v47 }
 0x6f4   : > { %v3205_v49 = vpop.f32.mrf.mxu1 }
 0x6f5   : > { %v1496_v50 = vadd.f32 %v1491_v48, %v3574_v18  ;;  %v3343_v18 = vld [vmem:[%s3951_s10] sm:$0xff]  }
 0x6f6   : > { %v1493_v51 = vpop.f32.mrf.mxu1  ;;  %3210 = vmatpush3.bf16.msra.mxu0 %v3343_v18  ;;  %v3013_v48 = vld [vmem:[%s3955_s14] ss:$0 sm:$0xff] }
 0x6f7   : > { %v1499_v52 = vsel %vm641_vm0, %v1496_v50, 0.0  ;;  %3227 = vmatprep.subr.bf16.mxu0 %v3422_v8 }
 0x6f8   : > { %1500 = vadd.xlane.f32.xlu1 %v1499_v52  ;;  %v3206_v53 = vpop.f32.mrf.mxu1 }
 0x781   : > { %v1501_v54 = vpop.xlane.xlu1 %1500 }
 0x782   : > { %v1502_v55 = vmul.f32 0.03125, %v1501_v54  ;;  %v3020_v54 = vld [vmem:[%s3946_s5 + $0x1] ss:$0 sm:$0xff] }
 0x784   : > { %v1503_v56 = vsub.f32 %v1496_v50, %v1502_v55  ;;  %v3014_v50 = vld [vmem:[%s3956_s15] ss:$0 sm:$0xff] }
 0x786   : > { %v1504_v57 = vmul.f32 %v1503_v56, %v1503_v56 }
 0x788   : > { %v1505_v58 = vsel %vm641_vm0, %v1504_v57, 0.0 }
 0x789   : > { %1506 = vadd.xlane.f32.xlu0 %v1505_v58 }
 0x812   : > { %v1507_v60 = vpop.xlane.xlu0 %1506 }
 0x813   : > { %v1508_v61 = vmul.f32 0.03125, %v1507_v60 }
 0x815   : > { %v1509_v62 = vadd.f32 1e-12, %v1508_v61 }
 0x817   : > { %3380 = vrsqrt.f32 %v1509_v62 }
 0x824   : > { %v3381_v63 = vpop.eup %3380 }
 0x825   : > { %v1511_v1 = vmul.f32 %v3381_v63, %v1503_v56 }
 0x827   : > { %v1518_v3 = vmul.f32 %v3001_v0, %v1511_v1 }
 0x829   : > { %v1525_v4 = vadd.f32 %v3002_v2, %v1518_v3 }
 0x82b   : > { %v1526_v5 = vpack.c.bf16 %v1525_v4, %v1525_v4 }
 0x82d   : > { %3212 = vmatmul.mubr.msk.bf16.vlgmr.msra.gmra.mxu0 %vm641_vm0, %v1526_v5 }
 0x82e   : > { %3231 = vmatprep.mubr.msk.bf16.mxu0 %vm3423_vm1, %v3422_v8  ;;  %3228 = vmatpush3.bf16.msra.mxu0 %v3348_v42 }
 0x82f   : > { %3229 = vmatprep.subr.bf16.mxu0 %v3422_v8 }
 0x832   : > { %3230 = vmatpush3.bf16.msra.mxu0 %v3349_v43 }
 0x833   : > { %3235 = vmatprep.subr.mxu0 %v3422_v8 }
 0x8ed   : > { %v1587_v12 = vpop.f32.mrf.mxu0 }
 0x8ee   : > { %v1588_v13 = vadd.f32 %v3003_v11, %v1587_v12 }
 0x8ef   : > { %v3213_v14 = vpop.f32.mrf.mxu0 }
 0x8f0   : > { %v1594_v15 = vmul.f32 0.044715, %v1588_v13  ;;  %v1593_v24 = vmul.f32 0.5, %v1588_v13 }
 0x8f1   : > { %v1590_v16 = vpop.f32.mrf.mxu0 }
 0x8f2   : > { %v1595_v17 = vmul.f32 %v1594_v15, %v1588_v13 }
 0x8f3   : > { %v3214_v19 = vpop.f32.mrf.mxu0 }
 0x8f4   : > { %v1596_v20 = vmul.f32 %v1595_v17, %v1588_v13 }
 0x8f6   : > { %v1597_v21 = vadd.f32 %v1596_v20, %v1588_v13 }
 0x8f8   : > { %v1598_v22 = vmul.f32 0.7978846, %v1597_v21 }
 0x8fa   : > { %3382 = vtanh.f32 %v1598_v22 }
 0x907   : > { %v3383_v23 = vpop.eup %3382 }
 0x908   : > { %v1600_v25 = vadd.f32 1.0, %v3383_v23 }
 0x90a   : > { %v1601_v26 = vmul.f32 %v1600_v25, %v1593_v24 }
 0x90c   : > { %v1602_v27 = vpack.c.bf16 %v1601_v26, %v1601_v26 }
 0x90e   : > { %3224 = vmatmul.mubr.msk.bf16.vlgmr.msra.gmra.mxu1 %vm1642_vm5, %v1602_v27 }
 0x90f   : > { %3247 = vmatprep.mubr.msk.f32.mxu1 %vm3423_vm1, %v3422_v8 }
 0x9ce   : > { %v1680_v29 = vpop.f32.mrf.mxu1 }
 0x9cf   : > { %v1681_v30 = vadd.f32 %v3007_v28, %v1680_v29 }
 0x9d0   : > { %v3225_v31 = vpop.f32.mrf.mxu1 }
 0x9d1   : > { %v1686_v32 = vadd.f32 %v1681_v30, %v1525_v4 }
 0x9d2   : > { %v1683_v34 = vpop.f32.mrf.mxu1 }
 0x9d3   : > { %v1689_v35 = vsel %vm641_vm0, %v1686_v32, 0.0 }
 0x9d4   : > { %1690 = vadd.xlane.f32.xlu0 %v1689_v35  ;;  %v3226_v36 = vpop.f32.mrf.mxu1 }
 0xa5d   : > { %v1691_v37 = vpop.xlane.xlu0 %1690 }
 0xa5e   : > { %v1692_v38 = vmul.f32 0.03125, %v1691_v37 }
 0xa60   : > { %v1693_v39 = vsub.f32 %v1686_v32, %v1692_v38 }
 0xa62   : > { %v1694_v40 = vmul.f32 %v1693_v39, %v1693_v39 }
 0xa64   : > { %v1695_v41 = vsel %vm641_vm0, %v1694_v40, 0.0 }
 0xa65   : > { %1696 = vadd.xlane.f32.xlu1 %v1695_v41 }
 0xaee   : > { %v1697_v44 = vpop.xlane.xlu1 %1696 }
 0xaef   : > { %v1698_v45 = vmul.f32 0.03125, %v1697_v44 }
 0xaf1   : > { %v1699_v46 = vadd.f32 1e-12, %v1698_v45 }
 0xaf3   : > { %3384 = vrsqrt.f32 %v1699_v46 }
 0xb00   : > { %v3385_v47 = vpop.eup %3384 }
 0xb01   : > { %v1701_v49 = vmul.f32 %v3385_v47, %v1693_v39 }
 0xb03   : > { %v1708_v51 = vmul.f32 %v3013_v48, %v1701_v49 }
 0xb05   : > { %v3748_v52 = vadd.f32 %v3014_v50, %v1708_v51 }
 0xb07   : > { %v1716_v53 = vpack.c.bf16 %v3748_v52, %v3748_v52 }
 0xb09   : > { %3232 = vmatmul.mubr.msk.bf16.vlgmr.msra.gmra.mxu0 %vm641_vm0, %v1716_v53 }
 0xb0a   : > { %3237 = vmatprep.mubr.msk.f32.mxu0 %vm3423_vm1, %v3422_v8 }
 0xbc9   : > { %v1779_v55 = vpop.f32.mrf.mxu0 }
 0xbca   : > { %v1780_v56 = vadd.f32 %v3020_v54, %v1779_v55 }
 0xbcb   : > { %v3233_v57 = vpop.f32.mrf.mxu0 }
 0xbcc   : > { %1788 = vrot.lane.b32.xlu1 %v1780_v56, %s3426_s4  ;;  %1786 = vrot.lane.b32.xlu0 %v1780_v56, %s3425_s27  ;;  %s636_s27 = scalar_lea.vmem %s3961_s20, %s3983_s22 }
 0xbcd   : > { %v1782_v58 = vpop.f32.mrf.mxu0 }
 0xbcf   : > { %v3234_v59 = vpop.f32.mrf.mxu0 }
 0xbd0   : > { %1790 = vrot.lane.b32.xlu1 %v1780_v56, %s3424_s26  ;;  %1792 = vrot.lane.b32.xlu0 %v1780_v56, %s3427_s29  ;;  %s3978_s26 = smov 64  }
 0xc3e   : > { %v3762_v18 = vpop.permute.xlu1 %1788  ;;  %v3764_v60 = vpop.permute.xlu0 %1786 }
 0xc3f   : > { %1944 = vrot.lane.b32.xlu0 %v3762_v18, %s3427_s29  ;;  %1868 = vrot.lane.b32.xlu1 %v3764_v60, %s3427_s29 }
 0xc42   : > { %v3770_v61 = vpop.permute.xlu1 %1790  ;;  %v1793_v62 = vpop.permute.xlu0 %1792 }
 0xc43   : > { %2020 = vrot.lane.b32.xlu1 %v3770_v61, %s3427_s29  ;;  %3236 = vmatpush3.xpose.msk.msra.mxu0 %vm747_vm2, %v1793_v62 }
 0xc44   : > { %3240 = vmatprep.subr.mxu0 %v3422_v8 }
 0xc46   : > { %3238 = vmatmul.mubr.msk.f32.vlgmr.msra.gmra.mxu0 %vm747_vm2, %v1780_v56 }
 0xc47   : > { %3242 = vmatprep.mubr.msk.f32.mxu0 %vm3423_vm1, %v3422_v8 }
 0xcb1   : > { %v1869_v63 = vpop.permute.xlu1 %1868  ;;  %v1945_v0 = vpop.permute.xlu0 %1944 }
 0xcb2   : > { %3241 = vmatpush3.xpose.msk.msra.mxu0 %vm747_vm2, %v1869_v63  ;;  %3246 = vmatpush3.xpose.msk.msra.mxu1 %vm747_vm2, %v1945_v0 }
 0xcb3   : > { %3250 = vmatprep.subr.mxu0 %v3422_v8  ;;  %3255 = vmatprep.subr.mxu1 %v3422_v8 }
 0xcb5   : > { %v2021_v1 = vpop.permute.xlu1 %2020  ;;  %3243 = vmatmul.mubr.msk.f32.vlgmr.msra.gmra.mxu0 %vm747_vm2, %v3764_v60  ;;  %3248 = vmatmul.mubr.msk.f32.vlgmr.msra.gmra.mxu1 %vm747_vm2, %v3762_v18 }
 0xcb6   : > { %3251 = vmatpush3.xpose.msk.msra.mxu0 %vm747_vm2, %v2021_v1  ;;  %3252 = vmatprep.mubr.msk.f32.mxu0 %vm3423_vm1, %v3422_v8 }
 0xcb7   : > { %3257 = vmatprep.mubr.msk.f32.mxu1 %vm3423_vm1, %v3422_v8  ;;  %3260 = vmatprep.subr.mxu0 %v3422_v8 }
 0xcb9   : > { %3253 = vmatmul.mubr.msk.f32.vlgmr.msra.gmra.mxu0 %vm747_vm2, %v3770_v61 }
 0xcba   : > { %3262 = vmatprep.mubr.msk.f32.mxu0 %vm3423_vm1, %v3422_v8 }
 0xd06   : > { %v1864_v2 = vpop.f32.mrf.mxu0 }
 0xd07   : > { %v2096_v3 = vmul.f32 0.35355338, %v1864_v2 }
 0xd08   : > { %v3239_v4 = vpop.f32.mrf.mxu0 }
 0xd09   : > { %v2100_v5 = vadd.f32 %v3630_v33, %v2096_v3 }
 0xd0b   : > { %v2104_v6 = vsel %vm747_vm2, %v2100_v5, -inf }
 0xd0c   : > { %2105 = vmax.xlane.f32.xlu0 %v2104_v6  ;;  %v3351_v6 = vld [vmem:[%s3947_s6 + $0x10] sm:$0xff]  }
 0xd75   : > { %v1940_v7 = vpop.f32.mrf.mxu0  ;;  %v2016_v9 = vpop.f32.mrf.mxu1 }
 0xd76   : > { %v2097_v10 = vmul.f32 0.35355338, %v1940_v7  ;;  %v2098_v11 = vmul.f32 0.35355338, %v2016_v9 }
 0xd77   : > { %v3244_v12 = vpop.f32.mrf.mxu0  ;;  %v3249_v13 = vpop.f32.mrf.mxu1 }
 0xd78   : > { %v2102_v14 = vadd.f32 %v3630_v33, %v2098_v11  ;;  %v2101_v15 = vadd.f32 %v3630_v33, %v2097_v10 }
 0xd79   : > { %v2092_v16 = vpop.f32.mrf.mxu0 }
 0xd7a   : > { %v2099_v17 = vmul.f32 0.35355338, %v2092_v16  ;;  %v2110_v19 = vsel %vm747_vm2, %v2102_v14, -inf  ;;  %v2107_v20 = vsel %vm747_vm2, %v2101_v15, -inf }
 0xd7b   : > { %2111 = vmax.xlane.f32.xlu0 %v2110_v19  ;;  %2108 = vmax.xlane.f32.xlu1 %v2107_v20  ;;  %v3254_v21 = vpop.f32.mrf.mxu0 }
 0xd7c   : > { %v2103_v22 = vadd.f32 %v3630_v33, %v2099_v17 }
 0xd7e   : > { %v2113_v23 = vsel %vm747_vm2, %v2103_v22, -inf }
 0xd7f   : > { %2114 = vmax.xlane.f32.xlu0 %v2113_v23 }
 0xd8c   : > { %2157 = vrot.lane.b32.xlu1 %v1780_v56, %s3978_s26 }
 0xd95   : > { %v2106_v24 = vpop.xlane.xlu0 %2105 }
 0xd96   : > { %v2116_v25 = vsub.f32 %v2100_v5, %v2106_v24  ;;  %v3350_v5 = vld [vmem:[%s3947_s6 + $0x18] sm:$0xff]  }
 0xd98   : > { %v2120_v26 = vmul.f32 1.442695, %v2116_v25 }
 0xd9a   : > { %3386 = vpow2.f32 %v2120_v26 }
 0xda7   : > { %v3387_v27 = vpop.eup %3386 }
 0xda8   : > { %v2128_v28 = vsel %vm747_vm2, %v3387_v27, 0.0 }
 0xdb0   : > { %2129 = vadd.xlane.f32.xlu1 %v2128_v28 }
 0xe04   : > { %v2112_v29 = vpop.xlane.xlu0 %2111  ;;  %v2109_v30 = vpop.xlane.xlu1 %2108 }
 0xe05   : > { %v2118_v31 = vsub.f32 %v2102_v14, %v2112_v29  ;;  %v2117_v32 = vsub.f32 %v2101_v15, %v2109_v30 }
 0xe07   : > { %v2124_v34 = vmul.f32 1.442695, %v2118_v31  ;;  %v2122_v35 = vmul.f32 1.442695, %v2117_v32 }
 0xe08   : > { %v2158_v33 = vpop.permute.xlu1 %2157  ;;  %v2115_v36 = vpop.xlane.xlu0 %2114 }
 0xe09   : > { %3388 = vpow2.f32 %v2124_v34  ;;  %v2119_v37 = vsub.f32 %v2103_v22, %v2115_v36  ;;  %3256 = vmatpush3.msra.mxu1 %v2158_v33  ;;  %v3041_v22 = vld [vmem:[%s3948_s7 + $0x1] ss:$0 sm:$0xff]  ;;  %v3352_v33 = vld [vmem:[%s3951_s10 + $0x18] sm:$0xff]  }
 0xe0a   : > { %3390 = vpow2.f32 %v2122_v35  ;;  %3265 = vmatprep.subr.mxu1 %v3422_v8 }
 0xe0b   : > { %v2126_v38 = vmul.f32 1.442695, %v2119_v37 }
 0xe0d   : > { %3392 = vpow2.f32 %v2126_v38 }
 0xe16   : > { %v3389_v39 = vpop.eup %3388 }
 0xe17   : > { %v3391_v40 = vpop.eup %3390  ;;  %v2134_v41 = vsel %vm747_vm2, %v3389_v39, 0.0 }
 0xe18   : > { %2135 = vadd.xlane.f32.xlu1 %v2134_v41  ;;  %v2131_v42 = vsel %vm747_vm2, %v3391_v40, 0.0 }
 0xe19   : > { %2132 = vadd.xlane.f32.xlu0 %v2131_v42  ;;  %v3048_v42 = vld [vmem:[%s3950_s9 + $0x1] ss:$0 sm:$0xff] }
 0xe1a   : > { %v3393_v43 = vpop.eup %3392 }
 0xe1b   : > { %v2137_v44 = vsel %vm747_vm2, %v3393_v43, 0.0 }
 0xe1d   : > { %2138 = vadd.xlane.f32.xlu0 %v2137_v44 }
 0xe29   : > { %2309 = vrot.lane.b32.xlu1 %v3762_v18, %s3978_s26 }
 0xe2d   : > { %2385 = vrot.lane.b32.xlu1 %v3770_v61, %s3978_s26 }
 0xe33   : > { %2233 = vrot.lane.b32.xlu0 %v3764_v60, %s3978_s26 }
 0xe39   : > { %v2130_v45 = vpop.xlane.xlu1 %2129 }
 0xe3a   : > { %3394 = vrcp.f32 %v2130_v45 }
 0xe47   : > { %v3395_v46 = vpop.eup %3394 }
 0xe48   : > { %v2141_v47 = vmul.f32 %v3395_v46, %v3387_v27  ;;  %v3354_v46 = vld [vmem:[%s3953_s12 + $0x38] sm:$0xff]  }
 0xe4a   : > { %3258 = vmatmul.mubr.msk.f32.vlgmr.msra.gmra.mxu1 %vm747_vm2, %v2141_v47  ;;  %v2149_v59 = vsel %vm2148_vm6, %v2141_v47, 0.0  ;;  %v3355_v47 = vld [vmem:[%s3953_s12 + $0x30] sm:$0xff]  }
 0xe4b   : > { %3267 = vmatprep.mubr.msk.f32.mxu1 %vm3423_vm1, %v3422_v8 }
 0xea1   : > { %v2136_v48 = vpop.xlane.xlu1 %2135 }
 0xea2   : > { %3396 = vrcp.f32 %v2136_v48  ;;  %v2133_v49 = vpop.xlane.xlu0 %2132  ;;  %v3356_v48 = vld [vmem:[%s3953_s12 + $0x28] sm:$0xff]  }
 0xea3   : > { %3398 = vrcp.f32 %v2133_v49  ;;  %v3357_v49 = vld [vmem:[%s3953_s12 + $0x20] sm:$0xff]  }
 0xea5   : > { %v2310_v50 = vpop.permute.xlu1 %2309 }
 0xea6   : > { %v2139_v51 = vpop.xlane.xlu0 %2138  ;;  %3266 = vmatpush3.msra.mxu1 %v2310_v50  ;;  %v3054_v50 = vld [vmem:[%s3952_s11 + $0x1] ss:$0 sm:$0xff] }
 0xea7   : > { %3400 = vrcp.f32 %v2139_v51  ;;  %3275 = vmatprep.subr.bf16.mxu1 %v3422_v8 }
 0xea9   : > { %v2386_v58 = vpop.permute.xlu1 %2385 }
 0xeaa   : > { %v2234_v53 = vpop.permute.xlu0 %2233 }
 0xeab   : > { %3261 = vmatpush3.msra.mxu0 %v2234_v53 }
 0xeac   : > { %3270 = vmatprep.subr.mxu0 %v3422_v8 }
 0xeaf   : > { %v3397_v54 = vpop.eup %3396 }
 0xeb0   : > { %v3399_v55 = vpop.eup %3398  ;;  %v2145_v56 = vmul.f32 %v3397_v54, %v3389_v39 }
 0xeb1   : > { %v2143_v57 = vmul.f32 %v3399_v55, %v3391_v40  ;;  %v3047_v40 = vld [vmem:[%s3949_s8 + $0x1] ss:$0 sm:$0xff] }
 0xeb2   : > { %3268 = vmatmul.mubr.msk.f32.vlgmr.msra.gmra.mxu1 %vm747_vm2, %v2145_v56  ;;  %v2152_v63 = vsel %vm2148_vm6, %v2145_v56, 0.0 }
 0xeb3   : > { %3263 = vmatmul.mubr.msk.f32.vlgmr.msra.gmra.mxu0 %vm747_vm2, %v2143_v57  ;;  %3279 = vmatprep.mubr.msk.bf16.mxu1 %vm3423_vm1, %v3422_v8  ;;  %v2150_v18 = vsel %vm2148_vm6, %v2143_v57, 0.0 }
 0xeb4   : > { %v3401_v60 = vpop.eup %3400  ;;  %3271 = vmatpush3.msra.mxu0 %v2386_v58  ;;  %3272 = vmatprep.mubr.msk.f32.mxu0 %vm3423_vm1, %v3422_v8  ;;  %v2151_v61 = vadd.f32 %v2150_v18, %v2149_v59 }
 0xeb5   : > { %v2147_v62 = vmul.f32 %v3401_v60, %v3393_v43  ;;  %3283 = vmatprep.subr.bf16.mxu0 %v3422_v8  ;;  %3276 = vmatpush3.bf16.msra.mxu1 %v3350_v5 }
 0xeb6   : > { %v2153_v0 = vadd.f32 %v2152_v63, %v2151_v61  ;;  %3277 = vmatprep.subr.bf16.mxu1 %v3422_v8 }
 0xeb7   : > { %3273 = vmatmul.mubr.msk.f32.vlgmr.msra.gmra.mxu0 %vm747_vm2, %v2147_v62  ;;  %v2154_v1 = vsel %vm2148_vm6, %v2147_v62, 0.0 }
 0xeb8   : > { %3287 = vmatprep.mubr.msk.bf16.mxu0 %vm3423_vm1, %v3422_v8  ;;  %v3836_v2 = vadd.f32 %v2154_v1, %v2153_v0  ;;  %3284 = vmatpush3.bf16.msra.mxu0 %v3352_v33 }
 0xeb9   : > { %3278 = vmatpush3.bf16.msra.mxu1 %v3351_v6  ;;  %3285 = vmatprep.subr.bf16.mxu0 %v3422_v8 }
 0xeba   : > { %3291 = vmatprep.subr.bf16.mxu1 %v3422_v8 }
 0xf0a   : > { %v2229_v3 = vpop.f32.mrf.mxu1 }
 0xf0c   : > { %v3259_v4 = vpop.f32.mrf.mxu1 }
 0xf72   : > { %v2381_v7 = vpop.f32.mrf.mxu1 }
 0xf73   : > { %v2305_v9 = vpop.f32.mrf.mxu0  ;;  %2466 = vrot.lane.b32.xlu1 %v2381_v7, %s3979_s30 }
 0xf74   : > { %2462 = vrot.lane.b32.xlu0 %v2305_v9, %s3980_s2  ;;  %v3269_v10 = vpop.f32.mrf.mxu1 }
 0xf75   : > { %v3264_v11 = vpop.f32.mrf.mxu0 }
 0xf77   : > { %v2457_v12 = vpop.f32.mrf.mxu0 }
 0xf78   : > { %2470 = vrot.lane.b32.xlu0 %v2457_v12, %s3981_s25 }
 0xf79   : > { %v3274_v13 = vpop.f32.mrf.mxu0 }
 0xfe5   : > { %v2467_v15 = vpop.permute.xlu1 %2466 }
 0xfe6   : > { %v2463_v14 = vpop.permute.xlu0 %2462 }
 0xfe7   : > { %v2473_v16 = vsel %vm747_vm2, %v2229_v3, %v2463_v14  ;;  %v3067_v3 = vld [vmem:[%s3954_s13 + $0x1] ss:$0 sm:$0xff] }
 0xfe8   : > { %v2474_v17 = vsel %vm1425_vm3, %v2473_v16, %v2467_v15 }
 0xfea   : > { %v2471_v19 = vpop.permute.xlu0 %2470 }
 0xfeb   : > { %v2475_v20 = vsel %vm1427_vm4, %v2474_v17, %v2471_v19  ;;  %v3358_v17 = vld [vmem:[%s3957_s16 + $0x8] sm:$0xff]   ;;  %v3359_v19 = vld [vmem:[%s3957_s16] sm:$0xff]  }
 0xfec   : > { %v2476_v21 = vpack.c.bf16 %v2475_v20, %v2475_v20 }
 0xfee   : > { %3280 = vmatmul.mubr.msk.bf16.vlgmr.msra.gmra.mxu1 %vm641_vm0, %v2476_v21 }
 0xfef   : > { %3299 = vmatprep.mubr.msk.bf16.mxu1 %vm3423_vm1, %v3422_v8  ;;  %3292 = vmatpush3.bf16.msra.mxu1 %v3354_v46 }
 0xff0   : > { %3293 = vmatprep.subr.bf16.mxu1 %v3422_v8 }
 0xff3   : > { %3294 = vmatpush3.bf16.msra.mxu1 %v3355_v47 }
 0xff4   : > { %3295 = vmatprep.subr.bf16.mxu1 %v3422_v8 }
 0xff7   : > { %3296 = vmatpush3.bf16.msra.mxu1 %v3356_v48 }
 0xff8   : > { %3297 = vmatprep.subr.bf16.mxu1 %v3422_v8 }
 0xffb   : > { %3298 = vmatpush3.bf16.msra.mxu1 %v3357_v49 }
0x10ae   : > { %v2539_v23 = vpop.f32.mrf.mxu1 }
0x10af   : > { %v2540_v24 = vadd.f32 %v3041_v22, %v2539_v23 }
0x10b0   : > { %v3281_v25 = vpop.f32.mrf.mxu1 }
0x10b1   : > { %v2545_v26 = vadd.f32 %v2540_v24, %v3748_v52  ;;  %v3353_v52 = vld [vmem:[%s3951_s10 + $0x10] sm:$0xff]   ;;  %v3075_v24 = vld [vmem:[%s3955_s14 + $0x1] ss:$0 sm:$0xff] }
0x10b2   : > { %v2542_v27 = vpop.f32.mrf.mxu1  ;;  %3286 = vmatpush3.bf16.msra.mxu0 %v3353_v52 }
0x10b3   : > { %v2550_v28 = vsel %vm641_vm0, %v2545_v26, 0.0  ;;  %3303 = vmatprep.subr.bf16.mxu0 %v3422_v8 }
0x10b4   : > { %2551 = vadd.xlane.f32.xlu1 %v2550_v28  ;;  %v3282_v29 = vpop.f32.mrf.mxu1 }
0x113d   : > { %v2552_v30 = vpop.xlane.xlu1 %2551 }
0x113e   : > { %v2553_v31 = vmul.f32 0.03125, %v2552_v30  ;;  %v3360_v30 = vld [vmem:[%s3959_s18 + $0x8] sm:$0xff]  }
0x1140   : > { %v2554_v32 = vsub.f32 %v2545_v26, %v2553_v31  ;;  %v3076_v26 = vld [vmem:[%s3956_s15 + $0x1] ss:$0 sm:$0xff] }
0x1141   : > { %v3361_v31 = vld [vmem:[%s3959_s18] sm:$0xff]  }
0x1142   : > { %v2555_v34 = vmul.f32 %v2554_v32, %v2554_v32 }
0x1144   : > { %v2556_v35 = vsel %vm641_vm0, %v2555_v34, 0.0 }
0x1145   : > { %2557 = vadd.xlane.f32.xlu0 %v2556_v35 }
0x11ce   : > { %v2558_v36 = vpop.xlane.xlu0 %2557 }
0x11cf   : > { %v2559_v37 = vmul.f32 0.03125, %v2558_v36 }
0x11d1   : > { %v2560_v38 = vadd.f32 1e-12, %v2559_v37 }
0x11d3   : > { %3402 = vrsqrt.f32 %v2560_v38 }
0x11e0   : > { %v3403_v39 = vpop.eup %3402 }
0x11e1   : > { %v2562_v41 = vmul.f32 %v3403_v39, %v2554_v32  ;;  %v2777_v32 = vld [vmem:[%s3958_s17] sm:$0x1] }
0x11e3   : > { %v2569_v43 = vmul.f32 %v3047_v40, %v2562_v41 }
0x11e5   : > { %v2576_v44 = vadd.f32 %v3048_v42, %v2569_v43 }
0x11e7   : > { %v2577_v45 = vpack.c.bf16 %v2576_v44, %v2576_v44 }
0x11e9   : > { %3288 = vmatmul.mubr.msk.bf16.vlgmr.msra.gmra.mxu0 %vm641_vm0, %v2577_v45  ;;  %v2156_v45 = vmul.f32 0.25, %v3836_v2 }
0x11ea   : > { %3307 = vmatprep.mubr.msk.bf16.mxu0 %vm3423_vm1, %v3422_v8  ;;  %3304 = vmatpush3.bf16.msra.mxu0 %v3358_v17 }
0x11eb   : > { %3305 = vmatprep.subr.bf16.mxu0 %v3422_v8 }
0x11ee   : > { %3306 = vmatpush3.bf16.msra.mxu0 %v3359_v19 }
0x11ef   : > { %3311 = vmatprep.subr.bf16.mxu0 %v3422_v8 }
0x12a9   : > { %v2640_v51 = vpop.f32.mrf.mxu0 }
0x12aa   : > { %v2641_v53 = vadd.f32 %v3054_v50, %v2640_v51 }
0x12ab   : > { %v3289_v54 = vpop.f32.mrf.mxu0 }
0x12ac   : > { %v2647_v55 = vmul.f32 0.044715, %v2641_v53  ;;  %v2646_v62 = vmul.f32 0.5, %v2641_v53 }
0x12ad   : > { %v2643_v56 = vpop.f32.mrf.mxu0 }
0x12ae   : > { %v2648_v57 = vmul.f32 %v2647_v55, %v2641_v53 }
0x12af   : > { %v3290_v58 = vpop.f32.mrf.mxu0 }
0x12b0   : > { %v2649_v59 = vmul.f32 %v2648_v57, %v2641_v53 }
0x12b2   : > { %v2650_v18 = vadd.f32 %v2649_v59, %v2641_v53 }
0x12b4   : > { %v2651_v60 = vmul.f32 0.7978846, %v2650_v18 }
0x12b6   : > { %3404 = vtanh.f32 %v2651_v60 }
0x12c3   : > { %v3405_v61 = vpop.eup %3404 }
0x12c4   : > { %v2653_v63 = vadd.f32 1.0, %v3405_v61 }
0x12c6   : > { %v2654_v0 = vmul.f32 %v2653_v63, %v2646_v62 }
0x12c8   : > { %v2655_v1 = vpack.c.bf16 %v2654_v0, %v2654_v0 }
0x12ca   : > { %3300 = vmatmul.mubr.msk.bf16.vlgmr.msra.gmra.mxu1 %vm1642_vm5, %v2655_v1 }
0x138a   : > { %v2734_v4 = vpop.f32.mrf.mxu1 }
0x138b   : > { %v2735_v5 = vadd.f32 %v3067_v3, %v2734_v4 }
0x138c   : > { %v3301_v6 = vpop.f32.mrf.mxu1 }
0x138d   : > { %v2740_v7 = vadd.f32 %v2735_v5, %v2576_v44 }
0x138e   : > { %v2737_v9 = vpop.f32.mrf.mxu1 }
0x138f   : > { %v2745_v10 = vsel %vm641_vm0, %v2740_v7, 0.0 }
0x1390   : > { %2746 = vadd.xlane.f32.xlu0 %v2745_v10  ;;  %v3302_v11 = vpop.f32.mrf.mxu1 }
0x1419   : > { %v2747_v12 = vpop.xlane.xlu0 %2746 }
0x141a   : > { %v2748_v13 = vmul.f32 0.03125, %v2747_v12 }
0x141c   : > { %v2749_v14 = vsub.f32 %v2740_v7, %v2748_v13 }
0x141e   : > { %v2750_v15 = vmul.f32 %v2749_v14, %v2749_v14 }
0x1420   : > { %v2751_v16 = vsel %vm641_vm0, %v2750_v15, 0.0 }
0x1421   : > { %2752 = vadd.xlane.f32.xlu1 %v2751_v16 }
0x14aa   : > { %v2753_v20 = vpop.xlane.xlu1 %2752 }
0x14ab   : > { %v2754_v21 = vmul.f32 0.03125, %v2753_v20 }
0x14ad   : > { %v2755_v22 = vadd.f32 1e-12, %v2754_v21 }
0x14af   : > { %3406 = vrsqrt.f32 %v2755_v22 }
0x14bc   : > { %v3407_v23 = vpop.eup %3406 }
0x14bd   : > { %v2757_v25 = vmul.f32 %v3407_v23, %v2749_v14 }
0x14bf   : > { %v2764_v27 = vmul.f32 %v3075_v24, %v2757_v25 }
0x14c1   : > { %v2771_v28 = vadd.f32 %v3076_v26, %v2764_v27 }
0x14c3   : > { %v2772_v29 = vpack.c.bf16 %v2771_v28, %v2771_v28 }
0x14c5   : > { %3308 = vmatmul.mubr.msk.bf16.vlgmr.msra.gmra.mxu0 %vm641_vm0, %v2772_v29 }
0x14c6   : > { %3315 = vmatprep.mubr.msk.bf16.mxu0 %vm3423_vm1, %v3422_v8  ;;  %3312 = vmatpush3.bf16.msra.mxu0 %v3360_v30 }
0x14c7   : > { %3313 = vmatprep.subr.bf16.mxu0 %v3422_v8  ;;  %v2839_v8 = vld [vmem:[%s3960_s19] sm:$0x1] }
0x14ca   : > { %3314 = vmatpush3.bf16.msra.mxu0 %v3361_v31 }
0x1585   : > { %v2827_v34 = vpop.f32.mrf.mxu0 }
0x1586   : > { %v2828_v35 = vadd.f32 %v2827_v34, %v2777_v32 }
0x1587   : > { %v3309_v33 = vpop.f32.mrf.mxu0 }
0x1588   : > { %3408 = vtanh.f32 %v2828_v35 }
0x1589   : > { %v2830_v52 = vpop.f32.mrf.mxu0 }
0x158b   : > { %v3310_v36 = vpop.f32.mrf.mxu0 }
0x1595   : > { %v3409_v37 = vpop.eup %3408 }
0x1596   : > { %v2834_v38 = vpack.c.bf16 %v3409_v37, %v3409_v37 }
0x1598   : > { %3316 = vmatmul.mubr.msk.bf16.vlgmr.msra.gmra.mxu0 %vm641_vm0, %v2834_v38 }
0x1658   : > { %v2889_v39 = vpop.f32.mrf.mxu0 }
0x1659   : > { %v2890_v40 = vadd.f32 %v2889_v39, %v2839_v8 }
0x165a   : > { %v3317_v41 = vpop.f32.mrf.mxu0 }
0x165b   : > { %v2896_v42 = vsel %vm2895_vm7, %v2890_v40, -inf }
0x165c   : > { %2897 = vmax.xlane.f32.xlu0 %v2896_v42  ;;  %v2892_v43 = vpop.f32.mrf.mxu0 }
0x165e   : > { %v3318_v44 = vpop.f32.mrf.mxu0 }
0x1672   : > { %2908 = vrot.lane.b32.xlu0 %v2156_v45, %s3432_s0 }
0x16e5   : > { %v2898_v46 = vpop.xlane.xlu0 %2897 }
0x16e6   : > { %v2899_v47 = vsub.f32 %v2890_v40, %v2898_v46 }
0x16e8   : > { %v2900_v48 = vmul.f32 1.442695, %v2899_v47 }
0x16e9   : > { %v2909_v2 = vpop.permute.xlu0 %2908 }
0x16ea   : > { %3410 = vpow2.f32 %v2900_v48 }
0x16f7   : > { %v3411_v49 = vpop.eup %3410 }
0x16f8   : > { %v2902_v50 = vsel %vm2895_vm7, %v3411_v49, 0.0 }
0x16f9   : > { %2903 = vadd.xlane.f32.xlu1 %v2902_v50 }
0x1782   : > { %v2904_v51 = vpop.xlane.xlu1 %2903 }
0x1783   : > { %3412 = vrcp.f32 %v2904_v51 }
0x1790   : > { %v3413_v53 = vpop.eup %3412 }
0x1791   : > { %v2906_v54 = vmul.f32 %v3413_v53, %v3411_v49 }
0x1793   : > { %v2912_v55 = vsel %vm2911_vm8, %v2906_v54, %v2909_v2 }
0x1794   : > { %v2914_v56 = vsel %vm2913_vm9, %v2912_v55, 0.0 }
0x1795   : > { %2915 = vst [vmem:[%s636_s27] sm:$0x1] %v2914_v56 }
0x1796 PF: > { %s30_s1 = sadd.s32 1, %s3420_s1  }
0x1797   : > { %p27_p4 = scmp.ge.s32.totalorder %s30_s1, 4  }
0x1799   :  { %29 = sbr.rel (!%p27_p4) target bundleno = 6 (0x6), region = 145 }

</bundles_post_ra>
